<compile_context>
chip_gen: v6e
topology: v6e:2x2x1
jax: 0.10.0
libtpu: 0.0.40
codegen_flags: <defaults>
</compile_context>

<pallas_src>
import jax
import jax.numpy as jnp
from jax.experimental import pallas as pl
from jax.experimental.pallas import tpu as pltpu


_TILE_VMEM_BUDGET = 24 * 1024 * 1024   # double-buffered blocks, all generations
_PACKED_W_BUDGET = 8 * 1024 * 1024     # packed block-diagonal weight per kw


def _upsample_kernel(x_ref, a0_ref, a1_ref, b_ref, o_ref):
    # x_ref : (Cin, tH, 2W)        input rows, columns duplicated (x[..., l//2])
    # a0_ref: (2*Cout*tH, Cin*tH)  block-diag weights, kw=0, rows = (co, 2i+kh)
    # a1_ref: (2*Cout*tH, Cin*tH)  same for kw=1
    # b_ref : (2*Cout*tH, 1)       bias replicated per output row
    # o_ref : (Cout, 2*tH, 2W)     NCHW output rows for this (n, h-tile)
    cin, th, l2w = x_ref.shape
    # Free view: merges the outer Cin dim into the sublane dim (tH % 8 == 0).
    xb = x_ref[...].reshape(cin * th, l2w)
    r0 = jnp.dot(a0_ref[...], xb, preferred_element_type=jnp.float32)
    r1 = jnp.dot(a1_ref[...], xb, preferred_element_type=jnp.float32)
    # Even output columns (2j)   come from kw=0, odd columns (2j+1) from kw=1.
    lane = jax.lax.broadcasted_iota(jnp.int32, r0.shape, dimension=1)
    out = jnp.where((lane & 1) == 0, r0, r1) + b_ref[...].astype(jnp.float32)
    # Free view: splits the sublane dim (2*tH % 8 == 0); single dense store.
    o_ref[...] = out.reshape(o_ref.shape).astype(o_ref.dtype)


def _pick_tile_rows(h_pad, n_batch, cin, cout, w):
    """Pick tH: multiple of 8 dividing h_pad, within VMEM budget, >=4 grid steps."""
    k = h_pad // 8
    cands = sorted((8 * d for d in range(1, k + 1) if k % d == 0), reverse=True)

    def vmem_est(th):
        x_blk = cin * th * (2 * w) * 4
        o_blk = cout * (2 * th) * (2 * w) * 4
        a_res = 2 * (2 * cout * th) * (cin * th) * 4
        return 2 * (x_blk + o_blk) + a_res + 8 * cout * th + 8 * w

    th = cands[-1]  # smallest (== 8) fallback
    for c in cands:  # largest tile that fits the budgets
        if (vmem_est(c) <= _TILE_VMEM_BUDGET
                and (2 * cout * c) * (cin * c) * 4 <= _PACKED_W_BUDGET):
            th = c
            break
    # Keep >= 4 parallel grid steps (v7x megacore) as long as tH >= 8.
    while th > 8 and n_batch * (h_pad // th) < 4:
        th = max(c for c in cands if c < th)
    return th, vmem_est(th)


def upsample_conv_transpose2d(x_nchw, weight, bias):
    """ConvTranspose2d(kernel_size=2, stride=2) forward.

    x_nchw: (N, Cin, H, W)
    weight: (Cin, Cout, 2, 2)   -- PyTorch ConvTranspose2d weight layout
    bias:   (Cout,)
    returns: (N, Cout, 2H, 2W)  -- NCHW, written directly by the kernel
    """
    N, Cin, H, W = x_nchw.shape
    Cout = weight.shape[1]
    assert weight.shape == (Cin, Cout, 2, 2)

    H_pad = ((H + 7) // 8) * 8
    tH, vmem_est = _pick_tile_rows(H_pad, N, Cin, Cout, W)
    n_h_tiles = H_pad // tH

    # Input: duplicate each column -> x_rep[..., l] = x[..., l//2]; stays NCHW,
    # so there is no input-side NCHW->NHWC transpose at all.
    x_rep = jnp.repeat(x_nchw, 2, axis=3)                       # (N, Cin, H, 2W)
    if H_pad != H:
        x_rep = jnp.pad(x_rep, ((0, 0), (0, 0), (0, H_pad - H), (0, 0)))

    # Block-diagonal packed weights:
    #   A_kw[co*2tH + 2i + kh, ci*tH + i'] = weight[ci, co, kh, kw] * [i == i']
    # so the matmul result rows are already in NCHW output-row order.
    eye = jnp.eye(tH, dtype=weight.dtype)
    wt = jnp.transpose(weight, (1, 2, 0, 3))                    # (Cout, kh, Cin, kw)
    a = jnp.einsum("okcw,ij->woikcj", wt, eye)                  # (kw, Cout, i, kh, Cin, i')
    a = a.reshape(2, Cout * 2 * tH, Cin * tH)
    a0, a1 = a[0], a[1]
    b_rep = jnp.repeat(bias, 2 * tH).reshape(Cout * 2 * tH, 1)

    grid = (N, n_h_tiles)
    out_rows = 2 * H_pad

    flops = 2 * 2 * (2 * Cout * tH) * (Cin * tH) * (2 * W) * N * n_h_tiles
    bytes_accessed = 4 * (x_rep.size + a.size + b_rep.size
                          + N * Cout * out_rows * 2 * W)

    y = pl.pallas_call(
        _upsample_kernel,
        out_shape=jax.ShapeDtypeStruct((N, Cout, out_rows, 2 * W), x_nchw.dtype),
        grid=grid,
        in_specs=[
            # x block: one h-tile of duplicated-column input rows.
            pl.BlockSpec((None, Cin, tH, 2 * W), lambda n, h: (n, 0, h, 0)),
            # Packed weights + bias: constant index maps -> DMA'd once, resident.
            pl.BlockSpec((Cout * 2 * tH, Cin * tH), lambda n, h: (0, 0)),
            pl.BlockSpec((Cout * 2 * tH, Cin * tH), lambda n, h: (0, 0)),
            pl.BlockSpec((Cout * 2 * tH, 1), lambda n, h: (0, 0)),
        ],
        # Output block is a contiguous NCHW slab: for each co, 2*tH full rows
        # of 2W -> one contiguous HBM run per channel, no post-kernel passes.
        out_specs=pl.BlockSpec((None, Cout, 2 * tH, 2 * W),
                               lambda n, h: (n, 0, h, 0)),
        compiler_params=pltpu.CompilerParams(
            dimension_semantics=("parallel", "parallel"),
            vmem_limit_bytes=int(min(max(2 * vmem_est, 32 * 1024 * 1024),
                                     56 * 1024 * 1024)),
        ),
        cost_estimate=pl.CostEstimate(flops=flops, transcendentals=0,
                                      bytes_accessed=bytes_accessed),
    )(x_rep, a0, a1, b_rep)

    if H_pad != H:
        # Only hit when H % 8 != 0: padded rows hold bias-valued garbage.
        y = y[:, :, : 2 * H, :]
    return y


def _reference(x_nchw, weight, bias):
    # Pure-JAX reference: y[n,co,2i+kh,2j+kw] = sum_ci x[n,ci,i,j]*W[ci,co,kh,kw] + b[co]
    N, Cin, H, W = x_nchw.shape
    Cout = weight.shape[1]
    y = jnp.einsum("ncij,cokl->noijkl", x_nchw, weight)          # (N,Cout,H,W,2,2)
    y = jnp.transpose(y, (0, 1, 2, 4, 3, 5)).reshape(N, Cout, 2 * H, 2 * W)
    return y + bias[None, :, None, None]


if __name__ == "__main__":
    in_channels, out_channels = 4, 8
    N, H, W = 2, 16, 16

    key = jax.random.PRNGKey(0)
    kx, kwt, kb = jax.random.split(key, 3)
    x = jax.random.normal(kx, (N, in_channels, H, W), dtype=jnp.float32)
    # Deterministic synthetic "parameters" (not loaded from a checkpoint).
    weight = jax.random.normal(kwt, (in_channels, out_channels, 2, 2),
                               dtype=jnp.float32) * 0.1
    bias = jax.random.normal(kb, (out_channels,), dtype=jnp.float32) * 0.1

    upsample = jax.jit(upsample_conv_transpose2d)
    y = jax.block_until_ready(upsample(x, weight, bias))

    y_ref = _reference(x, weight, bias)
    assert y.shape == (N, out_channels, 2 * H, 2 * W), y.shape
    err = float(jnp.max(jnp.abs(y - y_ref)))
    assert err < 1e-4, f"mismatch vs reference: max abs err {err}"

    print("KERNEL_OK")
</pallas_src>

<mosaic_0001>
module attributes {stable_mosaic.version = 11 : i64} {
  func.func @_upsample_kernel(%arg0: i32, %arg1: i32, %arg2: memref<1x4x8x32xf32, #tpu.memory_space<vmem>>, %arg3: memref<128x32xf32, #tpu.memory_space<vmem>>, %arg4: memref<128x32xf32, #tpu.memory_space<vmem>>, %arg5: memref<128x1xf32, #tpu.memory_space<vmem>>, %arg6: memref<1x8x16x32xf32, #tpu.memory_space<vmem>>) attributes {dimension_semantics = [#tpu.dimension_semantics<parallel>, #tpu.dimension_semantics<parallel>], iteration_bounds = array<i64: 2, 2>, scalar_prefetch = 0 : i64, scratch_operands = 0 : i64, tpu.core_type = #tpu.core_type<tc>, window_params = [{transform_indices = @transform_0, window_bounds = array<i64: 1, 4, 8, 32>}, {pipeline_mode = #tpu.pipeline_mode<synchronous>, transform_indices = @transform_1, window_bounds = array<i64: 128, 32>}, {pipeline_mode = #tpu.pipeline_mode<synchronous>, transform_indices = @transform_2, window_bounds = array<i64: 128, 32>}, {pipeline_mode = #tpu.pipeline_mode<synchronous>, transform_indices = @transform_3, window_bounds = array<i64: 128, 1>}, {transform_indices = @transform_4, window_bounds = array<i64: 1, 8, 16, 32>}]} {
    %c0 = arith.constant 0 : index
    %c0_0 = arith.constant 0 : index
    %c0_1 = arith.constant 0 : index
    %c0_2 = arith.constant 0 : index
    %0 = vector.load %arg2[%c0, %c0_0, %c0_1, %c0_2] : memref<1x4x8x32xf32, #tpu.memory_space<vmem>>, vector<1x4x8x32xf32>
    %1 = vector.shape_cast %0 : vector<1x4x8x32xf32> to vector<4x8x32xf32>
    %2 = vector.shape_cast %1 : vector<4x8x32xf32> to vector<32x32xf32>
    %c0_3 = arith.constant 0 : index
    %c0_4 = arith.constant 0 : index
    %3 = vector.load %arg3[%c0_3, %c0_4] : memref<128x32xf32, #tpu.memory_space<vmem>>, vector<128x32xf32>
    %cst = arith.constant dense<0.000000e+00> : vector<128x32xf32>
    %4 = tpu.matmul %3, %2, %cst {dimension_numbers = #tpu.dot_dimension_numbers<[1], [0], [0], [1], [0, 0, 1, 1], [], []>} : vector<128x32xf32>, vector<32x32xf32>, vector<128x32xf32> -> vector<128x32xf32>
    %c0_5 = arith.constant 0 : index
    %c0_6 = arith.constant 0 : index
    %5 = vector.load %arg4[%c0_5, %c0_6] : memref<128x32xf32, #tpu.memory_space<vmem>>, vector<128x32xf32>
    %cst_7 = arith.constant dense<0.000000e+00> : vector<128x32xf32>
    %6 = tpu.matmul %5, %2, %cst_7 {dimension_numbers = #tpu.dot_dimension_numbers<[1], [0], [0], [1], [0, 0, 1, 1], [], []>} : vector<128x32xf32>, vector<32x32xf32>, vector<128x32xf32> -> vector<128x32xf32>
    %7 = tpu.iota {dimensions = array<i32: 1>} : vector<128x32xi32>
    %c1_i32 = arith.constant 1 : i32
    %8 = vector.broadcast %c1_i32 : i32 to vector<128x32xi32>
    %9 = arith.andi %7, %8 : vector<128x32xi32>
    %c0_i32 = arith.constant 0 : i32
    %10 = vector.broadcast %c0_i32 : i32 to vector<128x32xi32>
    %11 = arith.cmpi eq, %9, %10 : vector<128x32xi32>
    %12 = arith.select %11, %4, %6 : vector<128x32xi1>, vector<128x32xf32>
    %c0_8 = arith.constant 0 : index
    %c0_9 = arith.constant 0 : index
    %13 = vector.load %arg5[%c0_8, %c0_9] : memref<128x1xf32, #tpu.memory_space<vmem>>, vector<128x1xf32>
    %14 = vector.broadcast %13 : vector<128x1xf32> to vector<128x32xf32>
    %15 = arith.addf %12, %14 : vector<128x32xf32>
    %16 = vector.shape_cast %15 : vector<128x32xf32> to vector<8x16x32xf32>
    %c0_10 = arith.constant 0 : index
    %c0_11 = arith.constant 0 : index
    %c0_12 = arith.constant 0 : index
    %c0_13 = arith.constant 0 : index
    %17 = vector.load %arg6[%c0_10, %c0_11, %c0_12, %c0_13] : memref<1x8x16x32xf32, #tpu.memory_space<vmem>>, vector<1x8x16x32xf32>
    %18 = vector.shape_cast %17 : vector<1x8x16x32xf32> to vector<8x16x32xf32>
    %19 = vector.shape_cast %16 : vector<8x16x32xf32> to vector<1x8x16x32xf32>
    tpu.vector_store %arg6[%c0_10, %c0_11, %c0_12, %c0_13], %19 {strides = array<i32>} : memref<1x8x16x32xf32, #tpu.memory_space<vmem>>, vector<1x8x16x32xf32>,
    return
  }
  func.func @transform_0(%arg0: i32, %arg1: i32) -> (i32, i32, i32, i32) {
    %c0_i32 = arith.constant 0 : i32
    %c0_i32_0 = arith.constant 0 : i32
    %c0_i32_1 = arith.constant 0 : i32
    return %arg0, %c0_i32, %arg1, %c0_i32_0 : i32, i32, i32, i32
  }
  func.func @transform_1(%arg0: i32, %arg1: i32) -> (i32, i32) {
    %c0_i32 = arith.constant 0 : i32
    %c0_i32_0 = arith.constant 0 : i32
    %c0_i32_1 = arith.constant 0 : i32
    return %c0_i32, %c0_i32_0 : i32, i32
  }
  func.func @transform_2(%arg0: i32, %arg1: i32) -> (i32, i32) {
    %c0_i32 = arith.constant 0 : i32
    %c0_i32_0 = arith.constant 0 : i32
    %c0_i32_1 = arith.constant 0 : i32
    return %c0_i32, %c0_i32_0 : i32, i32
  }
  func.func @transform_3(%arg0: i32, %arg1: i32) -> (i32, i32) {
    %c0_i32 = arith.constant 0 : i32
    %c0_i32_0 = arith.constant 0 : i32
    %c0_i32_1 = arith.constant 0 : i32
    return %c0_i32, %c0_i32_0 : i32, i32
  }
  func.func @transform_4(%arg0: i32, %arg1: i32) -> (i32, i32, i32, i32) {
    %c0_i32 = arith.constant 0 : i32
    %c0_i32_0 = arith.constant 0 : i32
    %c0_i32_1 = arith.constant 0 : i32
    return %arg0, %c0_i32, %arg1, %c0_i32_0 : i32, i32, i32, i32
  }
}

</mosaic_0001>

<bundles_post_ra>
// kernel: squeeze.2
= control target key start
LH: loop header
LB: loop body
LE: loop exit
PB: predicated region body
PF: predicated region fallthrough
CT: control target
= control target key end

     0   :  { %vm643_vm0 = vcmask 1047556   ;;  %s1623_s10 = smov 24   ;;  %vm645_vm1 = vcmask 64512   ;;  %s1625_s16 = smov 8   ;;  %vm790_vm2 = vcmask 261312   ;;  %vm965_vm3 = vcmask 195712   ;;  %s2388_s0 = inlined_call_operand.vmem [shape: f32[1,8,8,2,4,8], index: 0, kind: input, shape index: {}]   ;;  %s2389_s1 = inlined_call_operand.vmem [shape: f32[128,32], index: 1, kind: output, shape index: {}]  }
   0x1   :  { %v1553_v0 = vld [vmem:[%s2388_s0 + $0x1c] sm:$0xf]  ;;  %v1554_v1 = vld [vmem:[%s2388_s0 + $0x18] sm:$0xf]  ;;  %v1555_v2 = vld [vmem:[%s2388_s0 + $0x14] sm:$0xf] }
   0x2   :  { %609 = vst [vmem:[#allocation0 + $0x38] sm:$0xf] %v1553_v0  ;;  %614 = vst [vmem:[#allocation0 + $0x30] sm:$0xf] %v1554_v1  ;;  %v1556_v3 = vld [vmem:[%s2388_s0 + $0x10] sm:$0xf] }
   0x3   :  { %619 = vst [vmem:[#allocation0 + $0x28] sm:$0xf] %v1555_v2  ;;  %v1557_v4 = vld [vmem:[%s2388_s0 + $0xc] sm:$0xf]  ;;  %v1558_v5 = vld [vmem:[%s2388_s0 + $0x8] sm:$0xf] }
   0x4   :  { %624 = vst [vmem:[#allocation0 + $0x20] sm:$0xf] %v1556_v3  ;;  %629 = vst [vmem:[#allocation0 + $0x18] sm:$0xf] %v1557_v4  ;;  %v1559_v6 = vld [vmem:[%s2388_s0 + $0x4] sm:$0xf] }
   0x5   :  { %634 = vst [vmem:[#allocation0 + $0x10] sm:$0xf] %v1558_v5  ;;  %v639_v7 = vld [vmem:[%s2388_s0] sm:$0xf]  ;;  %638 = vst [vmem:[#allocation0 + $0x8] sm:$0xf] %v1559_v6 }
   0x6   :  { %640 = vst [vmem:[#allocation0] sm:$0xf] %v639_v7  ;;  %v1489_v8 = vld [vmem:[%s2388_s0 + $0x11c] sm:$0xf]  ;;  %v1490_v9 = vld [vmem:[%s2388_s0 + $0x118] sm:$0xf] }
   0x7   :  { %v1491_v10 = vld [vmem:[%s2388_s0 + $0x114] sm:$0xf]  ;;  %289 = vst [vmem:[#allocation0 + $0x238] sm:$0xf] %v1489_v8  ;;  %294 = vst [vmem:[#allocation0 + $0x230] sm:$0xf] %v1490_v9 }
   0x8   :  { %299 = vst [vmem:[#allocation0 + $0x228] sm:$0xf] %v1491_v10  ;;  %v1492_v11 = vld [vmem:[%s2388_s0 + $0x110] sm:$0xf]  ;;  %v1493_v12 = vld [vmem:[%s2388_s0 + $0x10c] sm:$0xf] }
   0x9   :  { %v1494_v13 = vld [vmem:[%s2388_s0 + $0x108] sm:$0xf]  ;;  %304 = vst [vmem:[#allocation0 + $0x220] sm:$0xf] %v1492_v11  ;;  %309 = vst [vmem:[#allocation0 + $0x218] sm:$0xf] %v1493_v12 }
   0xa   :  { %314 = vst [vmem:[#allocation0 + $0x210] sm:$0xf] %v1494_v13  ;;  %v1495_v14 = vld [vmem:[%s2388_s0 + $0x104] sm:$0xf]  ;;  %v1496_v15 = vld [vmem:[%s2388_s0 + $0x100] sm:$0xf] }
   0xb   :  { %v1521_v16 = vld [vmem:[%s2388_s0 + $0x9c] sm:$0xf]  ;;  %319 = vst [vmem:[#allocation0 + $0x208] sm:$0xf] %v1495_v14  ;;  %324 = vst [vmem:[#allocation0 + $0x200] sm:$0xf] %v1496_v15 }
   0xc   :  { %449 = vst [vmem:[#allocation0 + $0x138] sm:$0xf] %v1521_v16  ;;  %v1522_v17 = vld [vmem:[%s2388_s0 + $0x98] sm:$0xf]  ;;  %v1523_v18 = vld [vmem:[%s2388_s0 + $0x94] sm:$0xf] }
   0xd   :  { %v1524_v19 = vld [vmem:[%s2388_s0 + $0x90] sm:$0xf]  ;;  %454 = vst [vmem:[#allocation0 + $0x130] sm:$0xf] %v1522_v17  ;;  %459 = vst [vmem:[#allocation0 + $0x128] sm:$0xf] %v1523_v18 }
   0xe   :  { %464 = vst [vmem:[#allocation0 + $0x120] sm:$0xf] %v1524_v19  ;;  %v1525_v20 = vld [vmem:[%s2388_s0 + $0x8c] sm:$0xf]  ;;  %v1526_v21 = vld [vmem:[%s2388_s0 + $0x88] sm:$0xf] }
   0xf   :  { %v1527_v22 = vld [vmem:[%s2388_s0 + $0x84] sm:$0xf]  ;;  %469 = vst [vmem:[#allocation0 + $0x118] sm:$0xf] %v1525_v20  ;;  %474 = vst [vmem:[#allocation0 + $0x110] sm:$0xf] %v1526_v21 }
  0x10   :  { %479 = vst [vmem:[#allocation0 + $0x108] sm:$0xf] %v1527_v22  ;;  %v1528_v23 = vld [vmem:[%s2388_s0 + $0x80] sm:$0xf]  ;;  %v1457_v24 = vld [vmem:[%s2388_s0 + $0x19c] sm:$0xf] }
  0x11   :  { %v1458_v25 = vld [vmem:[%s2388_s0 + $0x198] sm:$0xf]  ;;  %484 = vst [vmem:[#allocation0 + $0x100] sm:$0xf] %v1528_v23  ;;  %129 = vst [vmem:[#allocation0 + $0x338] sm:$0xf] %v1457_v24 }
  0x12   :  { %v785_v26 = vld [vmem:[#allocation0 + $0x3] ss:$8 sm:$0xf0]   ;;  %134 = vst [vmem:[#allocation0 + $0x330] sm:$0xf] %v1458_v25  ;;  %vm1140_vm4 = vcmask 130112  }
  0x13   :  { %v1459_v27 = vld [vmem:[%s2388_s0 + $0x194] sm:$0xf]  ;;  %v783_v28 = vld [vmem:[#allocation0 + $0x3] ss:$8 sm:$0xf]  }
  0x14   :  { %139 = vst [vmem:[#allocation0 + $0x328] sm:$0xf] %v1459_v27  ;;  %v1460_v29 = vld [vmem:[%s2388_s0 + $0x190] sm:$0xf]  ;;  %v787_v30 = vsel %vm643_vm0, %v785_v26, %v783_v28  ;;  %v1461_v31 = vld [vmem:[%s2388_s0 + $0x18c] sm:$0xf] }
  0x15   :  { %144 = vst [vmem:[#allocation0 + $0x320] sm:$0xf] %v1460_v29  ;;  %v1462_v32 = vld [vmem:[%s2388_s0 + $0x188] sm:$0xf]  ;;  %v1463_v33 = vld [vmem:[%s2388_s0 + $0x184] sm:$0xf]  ;;  %788 = vrot.lane.b32.xlu0 %v787_v30, %s1623_s10 }
  0x16   :  { %v806_v34 = vld [vmem:[#allocation0 + $0x203] ss:$8 sm:$0xf0]   ;;  %149 = vst [vmem:[#allocation0 + $0x318] sm:$0xf] %v1461_v31 }
  0x17   :  { %154 = vst [vmem:[#allocation0 + $0x310] sm:$0xf] %v1462_v32  ;;  %159 = vst [vmem:[#allocation0 + $0x308] sm:$0xf] %v1463_v33  ;;  %v1464_v35 = vld [vmem:[%s2388_s0 + $0x180] sm:$0xf] }
  0x18   :  { %v804_v36 = vld [vmem:[#allocation0 + $0x203] ss:$8 sm:$0xf]   ;;  %164 = vst [vmem:[#allocation0 + $0x300] sm:$0xf] %v1464_v35 }
  0x19   :  { %v1545_v37 = vld [vmem:[%s2388_s0 + $0x3c] sm:$0xf]  ;;  %v808_v38 = vsel %vm643_vm0, %v806_v34, %v804_v36  ;;  %v795_v39 = vld [vmem:[#allocation0 + $0x103] ss:$8 sm:$0xf0]  }
  0x1a   :  { %569 = vst [vmem:[#allocation0 + $0x78] sm:$0xf] %v1545_v37  ;;  %v1546_v40 = vld [vmem:[%s2388_s0 + $0x38] sm:$0xf]  ;;  %809 = vrot.lane.b32.xlu1 %v808_v38, %s1623_s10  ;;  %v1547_v41 = vld [vmem:[%s2388_s0 + $0x34] sm:$0xf] }
  0x1b   :  { %574 = vst [vmem:[#allocation0 + $0x70] sm:$0xf] %v1546_v40  ;;  %v1548_v42 = vld [vmem:[%s2388_s0 + $0x30] sm:$0xf]  ;;  %v1549_v43 = vld [vmem:[%s2388_s0 + $0x2c] sm:$0xf] }
  0x1c   :  { %v793_v44 = vld [vmem:[#allocation0 + $0x103] ss:$8 sm:$0xf]   ;;  %579 = vst [vmem:[#allocation0 + $0x68] sm:$0xf] %v1547_v41 }
  0x1d   :  { %584 = vst [vmem:[#allocation0 + $0x60] sm:$0xf] %v1548_v42  ;;  %589 = vst [vmem:[#allocation0 + $0x58] sm:$0xf] %v1549_v43  ;;  %v1550_v45 = vld [vmem:[%s2388_s0 + $0x28] sm:$0xf]  ;;  %v797_v46 = vsel %vm643_vm0, %v795_v39, %v793_v44 }
  0x1e   :  { %594 = vst [vmem:[#allocation0 + $0x50] sm:$0xf] %v1550_v45  ;;  %v1551_v47 = vld [vmem:[%s2388_s0 + $0x24] sm:$0xf]  ;;  %v1552_v48 = vld [vmem:[%s2388_s0 + $0x20] sm:$0xf]  ;;  %798 = vrot.lane.b32.xlu0 %v797_v46, %s1623_s10 }
  0x1f   :  { %v1513_v49 = vld [vmem:[%s2388_s0 + $0xbc] sm:$0xf]  ;;  %v817_v50 = vld [vmem:[#allocation0 + $0x303] ss:$8 sm:$0xf0]  }
  0x20   :  { %599 = vst [vmem:[#allocation0 + $0x48] sm:$0xf] %v1551_v47  ;;  %604 = vst [vmem:[#allocation0 + $0x40] sm:$0xf] %v1552_v48  ;;  %v1514_v51 = vld [vmem:[%s2388_s0 + $0xb8] sm:$0xf] }
  0x21   :  { %409 = vst [vmem:[#allocation0 + $0x178] sm:$0xf] %v1513_v49  ;;  %414 = vst [vmem:[#allocation0 + $0x170] sm:$0xf] %v1514_v51  ;;  %v1515_v52 = vld [vmem:[%s2388_s0 + $0xb4] sm:$0xf] }
  0x22   :  { %v1516_v53 = vld [vmem:[%s2388_s0 + $0xb0] sm:$0xf]  ;;  %v1517_v54 = vld [vmem:[%s2388_s0 + $0xac] sm:$0xf]  ;;  %419 = vst [vmem:[#allocation0 + $0x168] sm:$0xf] %v1515_v52 }
  0x23   :  { %v815_v55 = vld [vmem:[#allocation0 + $0x303] ss:$8 sm:$0xf]   ;;  %424 = vst [vmem:[#allocation0 + $0x160] sm:$0xf] %v1516_v53 }
  0x24   :  { %429 = vst [vmem:[#allocation0 + $0x158] sm:$0xf] %v1517_v54  ;;  %v1518_v56 = vld [vmem:[%s2388_s0 + $0xa8] sm:$0xf]  ;;  %v819_v57 = vsel %vm643_vm0, %v817_v50, %v815_v55  ;;  %v1519_v58 = vld [vmem:[%s2388_s0 + $0xa4] sm:$0xf] }
  0x25   :  { %434 = vst [vmem:[#allocation0 + $0x150] sm:$0xf] %v1518_v56  ;;  %v1520_v59 = vld [vmem:[%s2388_s0 + $0xa0] sm:$0xf]  ;;  %v1481_v60 = vld [vmem:[%s2388_s0 + $0x13c] sm:$0xf]  ;;  %820 = vrot.lane.b32.xlu1 %v819_v57, %s1623_s10 }
  0x26   :  { %439 = vst [vmem:[#allocation0 + $0x148] sm:$0xf] %v1519_v58  ;;  %444 = vst [vmem:[#allocation0 + $0x140] sm:$0xf] %v1520_v59  ;;  %v1482_v61 = vld [vmem:[%s2388_s0 + $0x138] sm:$0xf] }
  0x27   :  { %249 = vst [vmem:[#allocation0 + $0x278] sm:$0xf] %v1481_v60  ;;  %v1483_v62 = vld [vmem:[%s2388_s0 + $0x134] sm:$0xf]  ;;  %v1484_v63 = vld [vmem:[%s2388_s0 + $0x130] sm:$0xf] }
  0x28   :  { %v828_v0 = vld [vmem:[#allocation0 + $0x43] ss:$8 sm:$0xf0]   ;;  %254 = vst [vmem:[#allocation0 + $0x270] sm:$0xf] %v1482_v61 }
  0x29   :  { %259 = vst [vmem:[#allocation0 + $0x268] sm:$0xf] %v1483_v62  ;;  %264 = vst [vmem:[#allocation0 + $0x260] sm:$0xf] %v1484_v63  ;;  %v1485_v1 = vld [vmem:[%s2388_s0 + $0x12c] sm:$0xf] }
  0x2a   :  { %269 = vst [vmem:[#allocation0 + $0x258] sm:$0xf] %v1485_v1  ;;  %v1486_v2 = vld [vmem:[%s2388_s0 + $0x128] sm:$0xf]  ;;  %v1487_v3 = vld [vmem:[%s2388_s0 + $0x124] sm:$0xf] }
  0x2b   :  { %v1488_v4 = vld [vmem:[%s2388_s0 + $0x120] sm:$0xf]  ;;  %274 = vst [vmem:[#allocation0 + $0x250] sm:$0xf] %v1486_v2  ;;  %279 = vst [vmem:[#allocation0 + $0x248] sm:$0xf] %v1487_v3 }
  0x2c   :  { %v826_v5 = vld [vmem:[#allocation0 + $0x43] ss:$8 sm:$0xf]   ;;  %284 = vst [vmem:[#allocation0 + $0x240] sm:$0xf] %v1488_v4 }
  0x2d   :  { %v1449_v6 = vld [vmem:[%s2388_s0 + $0x1bc] sm:$0xf]  ;;  %v830_v7 = vsel %vm643_vm0, %v828_v0, %v826_v5  ;;  %v1450_v8 = vld [vmem:[%s2388_s0 + $0x1b8] sm:$0xf]  ;;  %v1451_v9 = vld [vmem:[%s2388_s0 + $0x1b4] sm:$0xf] }
  0x2e   :  { %89 = vst [vmem:[#allocation0 + $0x378] sm:$0xf] %v1449_v6  ;;  %v1452_v10 = vld [vmem:[%s2388_s0 + $0x1b0] sm:$0xf]  ;;  %831 = vrot.lane.b32.xlu0 %v830_v7, %s1623_s10  ;;  %94 = vst [vmem:[#allocation0 + $0x370] sm:$0xf] %v1450_v8 }
  0x2f   :  { %v839_v11 = vld [vmem:[#allocation0 + $0x143] ss:$8 sm:$0xf0]   ;;  %99 = vst [vmem:[#allocation0 + $0x368] sm:$0xf] %v1451_v9 }
  0x30   :  { %104 = vst [vmem:[#allocation0 + $0x360] sm:$0xf] %v1452_v10  ;;  %v1453_v12 = vld [vmem:[%s2388_s0 + $0x1ac] sm:$0xf]  ;;  %v1454_v13 = vld [vmem:[%s2388_s0 + $0x1a8] sm:$0xf] }
  0x31   :  { %109 = vst [vmem:[#allocation0 + $0x358] sm:$0xf] %v1453_v12  ;;  %v1455_v14 = vld [vmem:[%s2388_s0 + $0x1a4] sm:$0xf]  ;;  %v1456_v15 = vld [vmem:[%s2388_s0 + $0x1a0] sm:$0xf] }
  0x32   :  { %v837_v16 = vld [vmem:[#allocation0 + $0x143] ss:$8 sm:$0xf]   ;;  %114 = vst [vmem:[#allocation0 + $0x350] sm:$0xf] %v1454_v13 }
  0x33   :  { %119 = vst [vmem:[#allocation0 + $0x348] sm:$0xf] %v1455_v14  ;;  %124 = vst [vmem:[#allocation0 + $0x340] sm:$0xf] %v1456_v15  ;;  %v1537_v17 = vld [vmem:[%s2388_s0 + $0x5c] sm:$0xf]  ;;  %v841_v18 = vsel %vm643_vm0, %v839_v11, %v837_v16 }
  0x34   :  { %v850_v19 = vld [vmem:[#allocation0 + $0x243] ss:$8 sm:$0xf0]   ;;  %529 = vst [vmem:[#allocation0 + $0xb8] sm:$0xf] %v1537_v17  ;;  %842 = vrot.lane.b32.xlu1 %v841_v18, %s1623_s10 }
  0x35   :  { %v1538_v20 = vld [vmem:[%s2388_s0 + $0x58] sm:$0xf]  ;;  %v1539_v21 = vld [vmem:[%s2388_s0 + $0x54] sm:$0xf]  ;;  %v1540_v22 = vld [vmem:[%s2388_s0 + $0x50] sm:$0xf] }
  0x36   :  { %534 = vst [vmem:[#allocation0 + $0xb0] sm:$0xf] %v1538_v20  ;;  %v1541_v23 = vld [vmem:[%s2388_s0 + $0x4c] sm:$0xf]  ;;  %539 = vst [vmem:[#allocation0 + $0xa8] sm:$0xf] %v1539_v21 }
  0x37   :  { %v848_v24 = vld [vmem:[#allocation0 + $0x243] ss:$8 sm:$0xf]   ;;  %544 = vst [vmem:[#allocation0 + $0xa0] sm:$0xf] %v1540_v22 }
  0x38   :  { %549 = vst [vmem:[#allocation0 + $0x98] sm:$0xf] %v1541_v23  ;;  %v1542_v25 = vld [vmem:[%s2388_s0 + $0x48] sm:$0xf]  ;;  %v852_v26 = vsel %vm643_vm0, %v850_v19, %v848_v24  ;;  %v1543_v27 = vld [vmem:[%s2388_s0 + $0x44] sm:$0xf] }
  0x39   :  { %554 = vst [vmem:[#allocation0 + $0x90] sm:$0xf] %v1542_v25  ;;  %v1544_v28 = vld [vmem:[%s2388_s0 + $0x40] sm:$0xf]  ;;  %v1505_v29 = vld [vmem:[%s2388_s0 + $0xdc] sm:$0xf]  ;;  %853 = vrot.lane.b32.xlu0 %v852_v26, %s1623_s10 }
  0x3a   :  { %v861_v30 = vld [vmem:[#allocation0 + $0x343] ss:$8 sm:$0xf0]   ;;  %559 = vst [vmem:[#allocation0 + $0x88] sm:$0xf] %v1543_v27 }
  0x3b   :  { %564 = vst [vmem:[#allocation0 + $0x80] sm:$0xf] %v1544_v28  ;;  %369 = vst [vmem:[#allocation0 + $0x1b8] sm:$0xf] %v1505_v29  ;;  %v1506_v31 = vld [vmem:[%s2388_s0 + $0xd8] sm:$0xf] }
  0x3c   :  { %374 = vst [vmem:[#allocation0 + $0x1b0] sm:$0xf] %v1506_v31  ;;  %v1507_v32 = vld [vmem:[%s2388_s0 + $0xd4] sm:$0xf]  ;;  %v1508_v33 = vld [vmem:[%s2388_s0 + $0xd0] sm:$0xf] }
  0x3d   :  { %v1509_v34 = vld [vmem:[%s2388_s0 + $0xcc] sm:$0xf]  ;;  %v859_v35 = vld [vmem:[#allocation0 + $0x343] ss:$8 sm:$0xf]  }
  0x3e   :  { %379 = vst [vmem:[#allocation0 + $0x1a8] sm:$0xf] %v1507_v32  ;;  %384 = vst [vmem:[#allocation0 + $0x1a0] sm:$0xf] %v1508_v33  ;;  %v1510_v36 = vld [vmem:[%s2388_s0 + $0xc8] sm:$0xf]  ;;  %v863_v37 = vsel %vm643_vm0, %v861_v30, %v859_v35 }
  0x3f   :  { %389 = vst [vmem:[#allocation0 + $0x198] sm:$0xf] %v1509_v34  ;;  %394 = vst [vmem:[#allocation0 + $0x190] sm:$0xf] %v1510_v36  ;;  %v1511_v38 = vld [vmem:[%s2388_s0 + $0xc4] sm:$0xf]  ;;  %864 = vrot.lane.b32.xlu1 %v863_v37, %s1623_s10 }
  0x40   :  { %v1512_v39 = vld [vmem:[%s2388_s0 + $0xc0] sm:$0xf]  ;;  %v1473_v40 = vld [vmem:[%s2388_s0 + $0x15c] sm:$0xf]  ;;  %399 = vst [vmem:[#allocation0 + $0x188] sm:$0xf] %v1511_v38 }
  0x41   :  { %404 = vst [vmem:[#allocation0 + $0x180] sm:$0xf] %v1512_v39  ;;  %209 = vst [vmem:[#allocation0 + $0x2b8] sm:$0xf] %v1473_v40  ;;  %v1474_v41 = vld [vmem:[%s2388_s0 + $0x158] sm:$0xf] }
  0x42   :  { %v1475_v42 = vld [vmem:[%s2388_s0 + $0x154] sm:$0xf]  ;;  %v1476_v43 = vld [vmem:[%s2388_s0 + $0x150] sm:$0xf]  ;;  %214 = vst [vmem:[#allocation0 + $0x2b0] sm:$0xf] %v1474_v41 }
  0x43   :  { %v872_v44 = vld [vmem:[#allocation0 + $0x83] ss:$8 sm:$0xf0]   ;;  %219 = vst [vmem:[#allocation0 + $0x2a8] sm:$0xf] %v1475_v42 }
  0x44   :  { %224 = vst [vmem:[#allocation0 + $0x2a0] sm:$0xf] %v1476_v43  ;;  %v1477_v45 = vld [vmem:[%s2388_s0 + $0x14c] sm:$0xf]  ;;  %v1478_v46 = vld [vmem:[%s2388_s0 + $0x148] sm:$0xf] }
  0x45   :  { %229 = vst [vmem:[#allocation0 + $0x298] sm:$0xf] %v1477_v45  ;;  %v1479_v47 = vld [vmem:[%s2388_s0 + $0x144] sm:$0xf]  ;;  %v1480_v48 = vld [vmem:[%s2388_s0 + $0x140] sm:$0xf] }
  0x46   :  { %v870_v49 = vld [vmem:[#allocation0 + $0x83] ss:$8 sm:$0xf]   ;;  %234 = vst [vmem:[#allocation0 + $0x290] sm:$0xf] %v1478_v46 }
  0x47   :  { %239 = vst [vmem:[#allocation0 + $0x288] sm:$0xf] %v1479_v47  ;;  %244 = vst [vmem:[#allocation0 + $0x280] sm:$0xf] %v1480_v48  ;;  %v1441_v50 = vld [vmem:[%s2388_s0 + $0x1dc] sm:$0xf]  ;;  %v874_v51 = vsel %vm643_vm0, %v872_v44, %v870_v49 }
  0x48   :  { %49 = vst [vmem:[#allocation0 + $0x3b8] sm:$0xf] %v1441_v50  ;;  %v1442_v52 = vld [vmem:[%s2388_s0 + $0x1d8] sm:$0xf]  ;;  %v1443_v53 = vld [vmem:[%s2388_s0 + $0x1d4] sm:$0xf]  ;;  %875 = vrot.lane.b32.xlu0 %v874_v51, %s1623_s10 }
  0x49   :  { %v1444_v54 = vld [vmem:[%s2388_s0 + $0x1d0] sm:$0xf]  ;;  %54 = vst [vmem:[#allocation0 + $0x3b0] sm:$0xf] %v1442_v52  ;;  %59 = vst [vmem:[#allocation0 + $0x3a8] sm:$0xf] %v1443_v53 }
  0x4a   :  { %v883_v55 = vld [vmem:[#allocation0 + $0x183] ss:$8 sm:$0xf0]   ;;  %64 = vst [vmem:[#allocation0 + $0x3a0] sm:$0xf] %v1444_v54 }
  0x4b   :  { %v1445_v56 = vld [vmem:[%s2388_s0 + $0x1cc] sm:$0xf]  ;;  %v1446_v57 = vld [vmem:[%s2388_s0 + $0x1c8] sm:$0xf]  ;;  %v1447_v58 = vld [vmem:[%s2388_s0 + $0x1c4] sm:$0xf] }
  0x4c   :  { %69 = vst [vmem:[#allocation0 + $0x398] sm:$0xf] %v1445_v56  ;;  %v1448_v59 = vld [vmem:[%s2388_s0 + $0x1c0] sm:$0xf]  ;;  %74 = vst [vmem:[#allocation0 + $0x390] sm:$0xf] %v1446_v57 }
  0x4d   :  { %v881_v60 = vld [vmem:[#allocation0 + $0x183] ss:$8 sm:$0xf]   ;;  %79 = vst [vmem:[#allocation0 + $0x388] sm:$0xf] %v1447_v58 }
  0x4e   :  { %84 = vst [vmem:[#allocation0 + $0x380] sm:$0xf] %v1448_v59  ;;  %v1529_v61 = vld [vmem:[%s2388_s0 + $0x7c] sm:$0xf]  ;;  %v885_v62 = vsel %vm643_vm0, %v883_v55, %v881_v60  ;;  %v1530_v0 = vld [vmem:[%s2388_s0 + $0x78] sm:$0xf] }
  0x4f   :  { %v894_v63 = vld [vmem:[#allocation0 + $0x283] ss:$8 sm:$0xf0]   ;;  %489 = vst [vmem:[#allocation0 + $0xf8] sm:$0xf] %v1529_v61  ;;  %886 = vrot.lane.b32.xlu1 %v885_v62, %s1623_s10 }
  0x50   :  { %494 = vst [vmem:[#allocation0 + $0xf0] sm:$0xf] %v1530_v0  ;;  %v1531_v1 = vld [vmem:[%s2388_s0 + $0x74] sm:$0xf]  ;;  %v1532_v2 = vld [vmem:[%s2388_s0 + $0x70] sm:$0xf] }
  0x51   :  { %v1533_v3 = vld [vmem:[%s2388_s0 + $0x6c] sm:$0xf]  ;;  %v892_v4 = vld [vmem:[#allocation0 + $0x283] ss:$8 sm:$0xf]  }
  0x52   :  { %499 = vst [vmem:[#allocation0 + $0xe8] sm:$0xf] %v1531_v1  ;;  %504 = vst [vmem:[#allocation0 + $0xe0] sm:$0xf] %v1532_v2  ;;  %v1534_v5 = vld [vmem:[%s2388_s0 + $0x68] sm:$0xf]  ;;  %v896_v6 = vsel %vm643_vm0, %v894_v63, %v892_v4 }
  0x53   :  { %509 = vst [vmem:[#allocation0 + $0xd8] sm:$0xf] %v1533_v3  ;;  %514 = vst [vmem:[#allocation0 + $0xd0] sm:$0xf] %v1534_v5  ;;  %v1535_v7 = vld [vmem:[%s2388_s0 + $0x64] sm:$0xf]  ;;  %897 = vrot.lane.b32.xlu0 %v896_v6, %s1623_s10 }
  0x54   :  { %v1536_v8 = vld [vmem:[%s2388_s0 + $0x60] sm:$0xf]  ;;  %v1497_v9 = vld [vmem:[%s2388_s0 + $0xfc] sm:$0xf]  ;;  %519 = vst [vmem:[#allocation0 + $0xc8] sm:$0xf] %v1535_v7 }
  0x55   :  { %v905_v10 = vld [vmem:[#allocation0 + $0x383] ss:$8 sm:$0xf0]   ;;  %524 = vst [vmem:[#allocation0 + $0xc0] sm:$0xf] %v1536_v8 }
  0x56   :  { %329 = vst [vmem:[#allocation0 + $0x1f8] sm:$0xf] %v1497_v9  ;;  %v1498_v11 = vld [vmem:[%s2388_s0 + $0xf8] sm:$0xf]  ;;  %v1499_v12 = vld [vmem:[%s2388_s0 + $0xf4] sm:$0xf] }
  0x57   :  { %334 = vst [vmem:[#allocation0 + $0x1f0] sm:$0xf] %v1498_v11  ;;  %v1500_v13 = vld [vmem:[%s2388_s0 + $0xf0] sm:$0xf]  ;;  %v1501_v14 = vld [vmem:[%s2388_s0 + $0xec] sm:$0xf] }
  0x58   :  { %v903_v15 = vld [vmem:[#allocation0 + $0x383] ss:$8 sm:$0xf]   ;;  %339 = vst [vmem:[#allocation0 + $0x1e8] sm:$0xf] %v1499_v12 }
  0x59   :  { %344 = vst [vmem:[#allocation0 + $0x1e0] sm:$0xf] %v1500_v13  ;;  %349 = vst [vmem:[#allocation0 + $0x1d8] sm:$0xf] %v1501_v14  ;;  %v1502_v16 = vld [vmem:[%s2388_s0 + $0xe8] sm:$0xf]  ;;  %v907_v17 = vsel %vm643_vm0, %v905_v10, %v903_v15 }
  0x5a   :  { %354 = vst [vmem:[#allocation0 + $0x1d0] sm:$0xf] %v1502_v16  ;;  %v1503_v18 = vld [vmem:[%s2388_s0 + $0xe4] sm:$0xf]  ;;  %v1504_v19 = vld [vmem:[%s2388_s0 + $0xe0] sm:$0xf]  ;;  %908 = vrot.lane.b32.xlu1 %v907_v17, %s1623_s10 }
  0x5b   :  { %v1465_v20 = vld [vmem:[%s2388_s0 + $0x17c] sm:$0xf]  ;;  %359 = vst [vmem:[#allocation0 + $0x1c8] sm:$0xf] %v1503_v18  ;;  %364 = vst [vmem:[#allocation0 + $0x1c0] sm:$0xf] %v1504_v19 }
  0x5c   :  { %169 = vst [vmem:[#allocation0 + $0x2f8] sm:$0xf] %v1465_v20  ;;  %v1466_v21 = vld [vmem:[%s2388_s0 + $0x178] sm:$0xf]  ;;  %v1467_v22 = vld [vmem:[%s2388_s0 + $0x174] sm:$0xf] }
  0x5d   :  { %v1468_v23 = vld [vmem:[%s2388_s0 + $0x170] sm:$0xf]  ;;  %174 = vst [vmem:[#allocation0 + $0x2f0] sm:$0xf] %v1466_v21  ;;  %179 = vst [vmem:[#allocation0 + $0x2e8] sm:$0xf] %v1467_v22 }
  0x5e   :  { %v916_v24 = vld [vmem:[#allocation0 + $0xc3] ss:$8 sm:$0xf0]   ;;  %184 = vst [vmem:[#allocation0 + $0x2e0] sm:$0xf] %v1468_v23 }
  0x5f   :  { %v1469_v25 = vld [vmem:[%s2388_s0 + $0x16c] sm:$0xf]  ;;  %v1470_v26 = vld [vmem:[%s2388_s0 + $0x168] sm:$0xf]  ;;  %v1471_v27 = vld [vmem:[%s2388_s0 + $0x164] sm:$0xf] }
  0x60   :  { %189 = vst [vmem:[#allocation0 + $0x2d8] sm:$0xf] %v1469_v25  ;;  %v1472_v28 = vld [vmem:[%s2388_s0 + $0x160] sm:$0xf]  ;;  %194 = vst [vmem:[#allocation0 + $0x2d0] sm:$0xf] %v1470_v26 }
  0x61   :  { %v914_v29 = vld [vmem:[#allocation0 + $0xc3] ss:$8 sm:$0xf]   ;;  %199 = vst [vmem:[#allocation0 + $0x2c8] sm:$0xf] %v1471_v27 }
  0x62   :  { %204 = vst [vmem:[#allocation0 + $0x2c0] sm:$0xf] %v1472_v28  ;;  %v1433_v30 = vld [vmem:[%s2388_s0 + $0x1fc] sm:$0xf]  ;;  %v918_v31 = vsel %vm643_vm0, %v916_v24, %v914_v29  ;;  %v1434_v32 = vld [vmem:[%s2388_s0 + $0x1f8] sm:$0xf] }
  0x63   :  { %9 = vst [vmem:[#allocation0 + $0x3f8] sm:$0xf] %v1433_v30  ;;  %v1435_v33 = vld [vmem:[%s2388_s0 + $0x1f4] sm:$0xf]  ;;  %v1436_v34 = vld [vmem:[%s2388_s0 + $0x1f0] sm:$0xf]  ;;  %919 = vrot.lane.b32.xlu0 %v918_v31, %s1623_s10 }
  0x64   :  { %v927_v35 = vld [vmem:[#allocation0 + $0x1c3] ss:$8 sm:$0xf0]   ;;  %14 = vst [vmem:[#allocation0 + $0x3f0] sm:$0xf] %v1434_v32 }
  0x65   :  { %19 = vst [vmem:[#allocation0 + $0x3e8] sm:$0xf] %v1435_v33  ;;  %24 = vst [vmem:[#allocation0 + $0x3e0] sm:$0xf] %v1436_v34  ;;  %v1437_v36 = vld [vmem:[%s2388_s0 + $0x1ec] sm:$0xf] }
  0x66   :  { %29 = vst [vmem:[#allocation0 + $0x3d8] sm:$0xf] %v1437_v36  ;;  %v1438_v37 = vld [vmem:[%s2388_s0 + $0x1e8] sm:$0xf]  ;;  %v1439_v38 = vld [vmem:[%s2388_s0 + $0x1e4] sm:$0xf] }
  0x67   :  { %v1440_v39 = vld [vmem:[%s2388_s0 + $0x1e0] sm:$0xf]  ;;  %34 = vst [vmem:[#allocation0 + $0x3d0] sm:$0xf] %v1438_v37  ;;  %39 = vst [vmem:[#allocation0 + $0x3c8] sm:$0xf] %v1439_v38 }
  0x68   :  { %v925_v40 = vld [vmem:[#allocation0 + $0x1c3] ss:$8 sm:$0xf]   ;;  %44 = vst [vmem:[#allocation0 + $0x3c0] sm:$0xf] %v1440_v39  ;;  %s1624_s0 = smov 16  }
  0x69   :  { %v929_v41 = vsel %vm643_vm0, %v927_v35, %v925_v40  ;;  %v938_v42 = vld [vmem:[#allocation0 + $0x2c3] ss:$8 sm:$0xf0]   ;;  %v958_v43 = vld [vmem:[#allocation0 + $0x2] ss:$8 sm:$0xf]  }
  0x6a   :  { %930 = vrot.lane.b32.xlu1 %v929_v41, %s1623_s10  ;;  %v936_v44 = vld [vmem:[#allocation0 + $0x2c3] ss:$8 sm:$0xf]   ;;  %v960_v45 = vld [vmem:[#allocation0 + $0x2] ss:$8 sm:$0xf0]  }
  0x6b   :  { %v940_v46 = vsel %vm643_vm0, %v938_v42, %v936_v44  ;;  %v968_v48 = vld [vmem:[#allocation0 + $0x102] ss:$8 sm:$0xf]   ;;  %v962_v49 = vsel %vm643_vm0, %v960_v45, %v958_v43  ;;  %v1133_v29 = vld [vmem:[#allocation0 + $0x1] ss:$8 sm:$0xf]  }
  0x6c   :  { %941 = vrot.lane.b32.xlu0 %v940_v46, %s1623_s10  ;;  %v949_v47 = vld [vmem:[#allocation0 + $0x3c3] ss:$8 sm:$0xf0]   ;;  %v970_v50 = vld [vmem:[#allocation0 + $0x102] ss:$8 sm:$0xf0]  }
  0x6d   :  { %v979_v51 = vld [vmem:[#allocation0 + $0x202] ss:$8 sm:$0xf]   ;;  %v972_v55 = vsel %vm643_vm0, %v970_v50, %v968_v48  ;;  %v1135_v32 = vld [vmem:[#allocation0 + $0x1] ss:$8 sm:$0xf0]  }
  0x6e   :  { %v981_v53 = vld [vmem:[#allocation0 + $0x202] ss:$8 sm:$0xf0]   ;;  %v641_v33 = vld [vmem:[#allocation0] ss:$8 sm:$0xf]  }
  0x6f   :  { %v947_v52 = vld [vmem:[#allocation0 + $0x3c3] ss:$8 sm:$0xf]   ;;  %v983_v56 = vsel %vm643_vm0, %v981_v53, %v979_v51  ;;  %v990_v57 = vld [vmem:[#allocation0 + $0x302] ss:$8 sm:$0xf]  }
  0x70   :  { %v951_v54 = vsel %vm643_vm0, %v949_v47, %v947_v52  ;;  %963 = vrot.lane.b32.xlu0 %v962_v49, %s1624_s0  ;;  %v992_v58 = vld [vmem:[#allocation0 + $0x302] ss:$8 sm:$0xf0]   ;;  %v642_v34 = vld [vmem:[#allocation0] ss:$8 sm:$0xf0]   ;;  %v1137_v47 = vsel %vm643_vm0, %v1135_v32, %v1133_v29 }
  0x71   :  { %952 = vrot.lane.b32.xlu1 %v951_v54, %s1623_s10  ;;  %v1001_v59 = vld [vmem:[#allocation0 + $0x42] ss:$8 sm:$0xf]   ;;  %v994_v61 = vsel %vm643_vm0, %v992_v58, %v990_v57  ;;  %v711_v35 = vld [vmem:[#allocation0 + $0x200] ss:$8 sm:$0xf]   ;;  %v644_v36 = vsel %vm643_vm0, %v642_v34, %v641_v33 }
  0x72   :  { %v1003_v60 = vld [vmem:[#allocation0 + $0x42] ss:$8 sm:$0xf0]   ;;  %v713_v37 = vld [vmem:[#allocation0 + $0x200] ss:$8 sm:$0xf0]  }
  0x73   :  { %v1005_v62 = vsel %vm643_vm0, %v1003_v60, %v1001_v59  ;;  %v1012_v63 = vld [vmem:[#allocation0 + $0x142] ss:$8 sm:$0xf]   ;;  %v675_v38 = vld [vmem:[#allocation0 + $0x100] ss:$8 sm:$0xf]   ;;  %v715_v43 = vsel %vm643_vm0, %v713_v37, %v711_v35 }
  0x74   :  { %984 = vrot.lane.b32.xlu0 %v983_v56, %s1624_s0  ;;  %v1014_v0 = vld [vmem:[#allocation0 + $0x142] ss:$8 sm:$0xf0]   ;;  %v1143_v39 = vld [vmem:[#allocation0 + $0x101] ss:$8 sm:$0xf]  }
  0x75   :  { %973 = vrot.lane.b32.xlu1 %v972_v55, %s1624_s0  ;;  %v1023_v1 = vld [vmem:[#allocation0 + $0x242] ss:$8 sm:$0xf]   ;;  %v1016_v3 = vsel %vm643_vm0, %v1014_v0, %v1012_v63  ;;  %v1145_v40 = vld [vmem:[#allocation0 + $0x101] ss:$8 sm:$0xf0]  }
  0x76   :  { %v1025_v2 = vld [vmem:[#allocation0 + $0x242] ss:$8 sm:$0xf0]   ;;  %v1154_v41 = vld [vmem:[#allocation0 + $0x201] ss:$8 sm:$0xf]   ;;  %v1147_v0 = vsel %vm643_vm0, %v1145_v40, %v1143_v39 }
  0x77   :  { %v1027_v4 = vsel %vm643_vm0, %v1025_v2, %v1023_v1  ;;  %v1034_v5 = vld [vmem:[#allocation0 + $0x342] ss:$8 sm:$0xf]   ;;  %v1156_v42 = vld [vmem:[#allocation0 + $0x201] ss:$8 sm:$0xf0]  }
  0x78   :  { %1006 = vrot.lane.b32.xlu0 %v1005_v62, %s1624_s0  ;;  %v1036_v6 = vld [vmem:[#allocation0 + $0x342] ss:$8 sm:$0xf0]   ;;  %646 = vst.msk [vmem:[%s2389_s1] sm:$0xff] %vm645_vm1, %v644_v36   ;;  %1567 = vst.msk [vmem:[%s2389_s1 + $0x40] sm:$0xff] %vm645_vm1, %v715_v43   ;;  %v1158_v1 = vsel %vm643_vm0, %v1156_v42, %v1154_v41 }
  0x79   :  { %995 = vrot.lane.b32.xlu1 %v994_v61, %s1624_s0  ;;  %v1045_v7 = vld [vmem:[#allocation0 + $0x82] ss:$8 sm:$0xf]   ;;  %v1038_v9 = vsel %vm643_vm0, %v1036_v6, %v1034_v5  ;;  %v677_v44 = vld [vmem:[#allocation0 + $0x100] ss:$8 sm:$0xf0]  }
  0x7a   :  { %v1047_v8 = vld [vmem:[#allocation0 + $0x82] ss:$8 sm:$0xf0]   ;;  %v747_v45 = vld [vmem:[#allocation0 + $0x300] ss:$8 sm:$0xf]   ;;  %v679_v48 = vsel %vm643_vm0, %v677_v44, %v675_v38 }
  0x7b   :  { %v1049_v10 = vsel %vm643_vm0, %v1047_v8, %v1045_v7  ;;  %v1056_v11 = vld [vmem:[#allocation0 + $0x182] ss:$8 sm:$0xf]   ;;  %v749_v49 = vld [vmem:[#allocation0 + $0x300] ss:$8 sm:$0xf0]  }
  0x7c   :  { %1028 = vrot.lane.b32.xlu0 %v1027_v4, %s1624_s0  ;;  %v1058_v12 = vld [vmem:[#allocation0 + $0x182] ss:$8 sm:$0xf0]   ;;  %v648_v50 = vld [vmem:[#allocation0 + $0x40] ss:$8 sm:$0xf]   ;;  %v751_v51 = vsel %vm643_vm0, %v749_v49, %v747_v45 }
  0x7d   :  { %1017 = vrot.lane.b32.xlu1 %v1016_v3, %s1624_s0  ;;  %v1067_v13 = vld [vmem:[#allocation0 + $0x282] ss:$8 sm:$0xf]   ;;  %v1060_v15 = vsel %vm643_vm0, %v1058_v12, %v1056_v11  ;;  %1563 = vst.msk [vmem:[%s2389_s1 + $0x20] sm:$0xff] %vm645_vm1, %v679_v48   ;;  %1571 = vst.msk [vmem:[%s2389_s1 + $0x60] sm:$0xff] %vm645_vm1, %v751_v51  }
  0x7e   :  { %v1069_v14 = vld [vmem:[#allocation0 + $0x282] ss:$8 sm:$0xf0]   ;;  %v650_v52 = vld [vmem:[#allocation0 + $0x40] ss:$8 sm:$0xf0]  }
  0x7f   :  { %v1071_v16 = vsel %vm643_vm0, %v1069_v14, %v1067_v13  ;;  %v1078_v17 = vld [vmem:[#allocation0 + $0x382] ss:$8 sm:$0xf]   ;;  %v684_v53 = vld [vmem:[#allocation0 + $0x140] ss:$8 sm:$0xf]   ;;  %v652_v54 = vsel %vm643_vm0, %v650_v52, %v648_v50 }
  0x80   :  { %1050 = vrot.lane.b32.xlu0 %v1049_v10, %s1624_s0  ;;  %v1080_v18 = vld [vmem:[#allocation0 + $0x382] ss:$8 sm:$0xf0]   ;;  %v686_v55 = vld [vmem:[#allocation0 + $0x140] ss:$8 sm:$0xf0]  }
  0x81   :  { %1039 = vrot.lane.b32.xlu1 %v1038_v9, %s1624_s0  ;;  %v1089_v19 = vld [vmem:[#allocation0 + $0xc2] ss:$8 sm:$0xf]   ;;  %v1082_v21 = vsel %vm643_vm0, %v1080_v18, %v1078_v17  ;;  %v720_v56 = vld [vmem:[#allocation0 + $0x240] ss:$8 sm:$0xf]   ;;  %v688_v61 = vsel %vm643_vm0, %v686_v55, %v684_v53 }
  0x82   :  { %v1091_v20 = vld [vmem:[#allocation0 + $0xc2] ss:$8 sm:$0xf0]   ;;  %v1165_v57 = vld [vmem:[#allocation0 + $0x301] ss:$8 sm:$0xf]  }
  0x83   :  { %v1093_v22 = vsel %vm643_vm0, %v1091_v20, %v1089_v19  ;;  %v1100_v23 = vld [vmem:[#allocation0 + $0x1c2] ss:$8 sm:$0xf]   ;;  %v1167_v58 = vld [vmem:[#allocation0 + $0x301] ss:$8 sm:$0xf0]  }
  0x84   :  { %1072 = vrot.lane.b32.xlu0 %v1071_v16, %s1624_s0  ;;  %v1102_v24 = vld [vmem:[#allocation0 + $0x1c2] ss:$8 sm:$0xf0]   ;;  %v1176_v59 = vld [vmem:[#allocation0 + $0x41] ss:$8 sm:$0xf]   ;;  %v1169_v18 = vsel %vm643_vm0, %v1167_v58, %v1165_v57 }
  0x85   :  { %1061 = vrot.lane.b32.xlu1 %v1060_v15, %s1624_s0  ;;  %v1111_v25 = vld [vmem:[#allocation0 + $0x2c2] ss:$8 sm:$0xf]   ;;  %v1104_v30 = vsel %vm643_vm0, %v1102_v24, %v1100_v23  ;;  %v1178_v60 = vld [vmem:[#allocation0 + $0x41] ss:$8 sm:$0xf0]  }
  0x86   :  { %v1113_v26 = vld [vmem:[#allocation0 + $0x2c2] ss:$8 sm:$0xf0]   ;;  %1560 = vst.msk [vmem:[%s2389_s1 + $0x8] sm:$0xff] %vm645_vm1, %v652_v54   ;;  %1564 = vst.msk [vmem:[%s2389_s1 + $0x28] sm:$0xff] %vm645_vm1, %v688_v61   ;;  %v1180_v19 = vsel %vm643_vm0, %v1178_v60, %v1176_v59 }
  0x87   :  { %v1122_v27 = vld [vmem:[#allocation0 + $0x3c2] ss:$8 sm:$0xf]   ;;  %v1115_v31 = vsel %vm643_vm0, %v1113_v26, %v1111_v25  ;;  %v722_v62 = vld [vmem:[#allocation0 + $0x240] ss:$8 sm:$0xf0]   ;;  %v789_v59 = vpop.permute.xlu0 %788  }
  0x88   :  { %1094 = vrot.lane.b32.xlu0 %v1093_v22, %s1624_s0  ;;  %v1124_v28 = vld [vmem:[#allocation0 + $0x3c2] ss:$8 sm:$0xf0]   ;;  %v756_v63 = vld [vmem:[#allocation0 + $0x340] ss:$8 sm:$0xf]   ;;  %v724_v2 = vsel %vm643_vm0, %v722_v62, %v720_v56 }
  0x89   :  { %1083 = vrot.lane.b32.xlu1 %v1082_v21, %s1624_s0  ;;  %v1126_v46 = vsel %vm643_vm0, %v1124_v28, %v1122_v27  ;;  %v758_v3 = vld [vmem:[#allocation0 + $0x340] ss:$8 sm:$0xf0]   ;;  %1568 = vst.msk [vmem:[%s2389_s1 + $0x48] sm:$0xff] %vm645_vm1, %v724_v2  }
  0x8a   :  { %v657_v4 = vld [vmem:[#allocation0 + $0x80] ss:$8 sm:$0xf]   ;;  %v760_v5 = vsel %vm643_vm0, %v758_v3, %v756_v63  ;;  %v1187_v11 = vld [vmem:[#allocation0 + $0x141] ss:$8 sm:$0xf]  }
  0x8b   :  { %v659_v6 = vld [vmem:[#allocation0 + $0x80] ss:$8 sm:$0xf0]   ;;  %1572 = vst.msk [vmem:[%s2389_s1 + $0x68] sm:$0xff] %vm645_vm1, %v760_v5  }
  0x8c   :  { %1116 = vrot.lane.b32.xlu0 %v1115_v31, %s1624_s0  ;;  %v693_v7 = vld [vmem:[#allocation0 + $0x180] ss:$8 sm:$0xf]   ;;  %v661_v8 = vsel %vm643_vm0, %v659_v6, %v657_v4  ;;  %v1189_v12 = vld [vmem:[#allocation0 + $0x141] ss:$8 sm:$0xf0]  }
  0x8d   :  { %1105 = vrot.lane.b32.xlu1 %v1104_v30, %s1624_s0  ;;  %v695_v9 = vld [vmem:[#allocation0 + $0x180] ss:$8 sm:$0xf0]   ;;  %v1198_v13 = vld [vmem:[#allocation0 + $0x241] ss:$8 sm:$0xf]   ;;  %v1191_v33 = vsel %vm643_vm0, %v1189_v12, %v1187_v11 }
  0x8e   :  { %v729_v10 = vld [vmem:[#allocation0 + $0x280] ss:$8 sm:$0xf]   ;;  %v1200_v14 = vld [vmem:[#allocation0 + $0x241] ss:$8 sm:$0xf0]   ;;  %v697_v15 = vsel %vm643_vm0, %v695_v9, %v693_v7 }
  0x8f   :  { %1561 = vst.msk [vmem:[%s2389_s1 + $0x10] sm:$0xff] %vm645_vm1, %v661_v8   ;;  %v731_v16 = vld [vmem:[#allocation0 + $0x280] ss:$8 sm:$0xf0]   ;;  %1565 = vst.msk [vmem:[%s2389_s1 + $0x30] sm:$0xff] %vm645_vm1, %v697_v15   ;;  %v1202_v34 = vsel %vm643_vm0, %v1200_v14, %v1198_v13 }
  0x90   :  { %1138 = vrot.lane.b32.xlu0 %v1137_v47, %s1625_s16  ;;  %v765_v17 = vld [vmem:[#allocation0 + $0x380] ss:$8 sm:$0xf]   ;;  %v733_v20 = vsel %vm643_vm0, %v731_v16, %v729_v10  ;;  %v1209_v29 = vld [vmem:[#allocation0 + $0x341] ss:$8 sm:$0xf]   ;;  %v799_v2 = vpop.permute.xlu0 %798  }
  0x91   :  { %1127 = vrot.lane.b32.xlu1 %v1126_v46, %s1624_s0  ;;  %v767_v21 = vld [vmem:[#allocation0 + $0x380] ss:$8 sm:$0xf0]   ;;  %1569 = vst.msk [vmem:[%s2389_s1 + $0x50] sm:$0xff] %vm645_vm1, %v733_v20  }
  0x92   :  { %v666_v22 = vld [vmem:[#allocation0 + $0xc0] ss:$8 sm:$0xf]   ;;  %v769_v23 = vsel %vm643_vm0, %v767_v21, %v765_v17  ;;  %v1211_v35 = vld [vmem:[#allocation0 + $0x341] ss:$8 sm:$0xf0]  }
  0x93   :  { %v668_v24 = vld [vmem:[#allocation0 + $0xc0] ss:$8 sm:$0xf0]   ;;  %1573 = vst.msk [vmem:[%s2389_s1 + $0x70] sm:$0xff] %vm645_vm1, %v769_v23   ;;  %v1213_v41 = vsel %vm643_vm0, %v1211_v35, %v1209_v29 }
  0x94   :  { %1159 = vrot.lane.b32.xlu0 %v1158_v1, %s1625_s16  ;;  %v702_v25 = vld [vmem:[#allocation0 + $0x1c0] ss:$8 sm:$0xf]   ;;  %v670_v26 = vsel %vm643_vm0, %v668_v24, %v666_v22  ;;  %v1220_v38 = vld [vmem:[#allocation0 + $0x81] ss:$8 sm:$0xf]  }
  0x95   :  { %1148 = vrot.lane.b32.xlu1 %v1147_v0, %s1625_s16  ;;  %v704_v27 = vld [vmem:[#allocation0 + $0x1c0] ss:$8 sm:$0xf0]   ;;  %1562 = vst.msk [vmem:[%s2389_s1 + $0x18] sm:$0xff] %vm645_vm1, %v670_v26   ;;  %v810_v0 = vpop.permute.xlu1 %809  }
  0x96   :  { %v738_v28 = vld [vmem:[#allocation0 + $0x2c0] ss:$8 sm:$0xf]   ;;  %v706_v30 = vsel %vm643_vm0, %v704_v27, %v702_v25  ;;  %v1222_v39 = vld [vmem:[#allocation0 + $0x81] ss:$8 sm:$0xf0]  }
  0x97   :  { %v740_v31 = vld [vmem:[#allocation0 + $0x2c0] ss:$8 sm:$0xf0]   ;;  %1566 = vst.msk [vmem:[%s2389_s1 + $0x38] sm:$0xff] %vm645_vm1, %v706_v30   ;;  %v1224_v42 = vsel %vm643_vm0, %v1222_v39, %v1220_v38 }
  0x98   :  { %1181 = vrot.lane.b32.xlu0 %v1180_v19, %s1625_s16  ;;  %v774_v32 = vld [vmem:[#allocation0 + $0x3c0] ss:$8 sm:$0xf]   ;;  %v742_v36 = vsel %vm643_vm0, %v740_v31, %v738_v28  ;;  %v1231_v43 = vld [vmem:[#allocation0 + $0x181] ss:$8 sm:$0xf]  }
  0x99   :  { %1170 = vrot.lane.b32.xlu1 %v1169_v18, %s1625_s16  ;;  %v776_v37 = vld [vmem:[#allocation0 + $0x3c0] ss:$8 sm:$0xf0]   ;;  %1570 = vst.msk [vmem:[%s2389_s1 + $0x58] sm:$0xff] %vm645_vm1, %v742_v36   ;;  %v821_v3 = vpop.permute.xlu1 %820  }
  0x9a   :  { %v778_v40 = vsel %vm643_vm0, %v776_v37, %v774_v32  ;;  %v1233_v44 = vld [vmem:[#allocation0 + $0x181] ss:$8 sm:$0xf0]   ;;  %791 = vst.msk [vmem:[%s2389_s1] sm:$0xff] %vm790_vm2, %v789_v59   ;;  %1576 = vst.msk [vmem:[%s2389_s1 + $0x40] sm:$0xff] %vm790_vm2, %v810_v0  }
  0x9b   :  { %1574 = vst.msk [vmem:[%s2389_s1 + $0x78] sm:$0xff] %vm645_vm1, %v778_v40   ;;  %v1242_v45 = vld [vmem:[#allocation0 + $0x281] ss:$8 sm:$0xf]   ;;  %v1235_v47 = vsel %vm643_vm0, %v1233_v44, %v1231_v43 }
  0x9c   :  { %1203 = vrot.lane.b32.xlu0 %v1202_v34, %s1625_s16  ;;  %v1244_v46 = vld [vmem:[#allocation0 + $0x281] ss:$8 sm:$0xf0]   ;;  %1575 = vst.msk [vmem:[%s2389_s1 + $0x20] sm:$0xff] %vm790_vm2, %v799_v2   ;;  %1577 = vst.msk [vmem:[%s2389_s1 + $0x60] sm:$0xff] %vm790_vm2, %v821_v3  }
  0x9d   :  { %1192 = vrot.lane.b32.xlu1 %v1191_v33, %s1625_s16  ;;  %v1246_v48 = vsel %vm643_vm0, %v1244_v46, %v1242_v45  ;;  %v1253_v49 = vld [vmem:[#allocation0 + $0x381] ss:$8 sm:$0xf]  }
  0x9e   :  { %v1255_v50 = vld [vmem:[#allocation0 + $0x381] ss:$8 sm:$0xf0]  }
  0x9f   :  { %v1264_v51 = vld [vmem:[#allocation0 + $0xc1] ss:$8 sm:$0xf]   ;;  %v1257_v53 = vsel %vm643_vm0, %v1255_v50, %v1253_v49 }
  0xa0   :  { %1225 = vrot.lane.b32.xlu0 %v1224_v42, %s1625_s16  ;;  %v1266_v52 = vld [vmem:[#allocation0 + $0xc1] ss:$8 sm:$0xf0]   ;;  %v832_v4 = vpop.permute.xlu0 %831  }
  0xa1   :  { %1214 = vrot.lane.b32.xlu1 %v1213_v41, %s1625_s16  ;;  %v1268_v54 = vsel %vm643_vm0, %v1266_v52, %v1264_v51  ;;  %v1275_v55 = vld [vmem:[#allocation0 + $0x1c1] ss:$8 sm:$0xf]   ;;  %1578 = vst.msk [vmem:[%s2389_s1 + $0x8] sm:$0xff] %vm790_vm2, %v832_v4  }
  0xa2   :  { %v1277_v56 = vld [vmem:[#allocation0 + $0x1c1] ss:$8 sm:$0xf0]  }
  0xa3   :  { %v1286_v57 = vld [vmem:[#allocation0 + $0x2c1] ss:$8 sm:$0xf]   ;;  %v1279_v60 = vsel %vm643_vm0, %v1277_v56, %v1275_v55 }
  0xa4   :  { %1247 = vrot.lane.b32.xlu0 %v1246_v48, %s1625_s16  ;;  %v1288_v58 = vld [vmem:[#allocation0 + $0x2c1] ss:$8 sm:$0xf0]  }
  0xa5   :  { %1236 = vrot.lane.b32.xlu1 %v1235_v47, %s1625_s16  ;;  %v1290_v61 = vsel %vm643_vm0, %v1288_v58, %v1286_v57  ;;  %v1297_v62 = vld [vmem:[#allocation0 + $0x3c1] ss:$8 sm:$0xf]  }
  0xa6   :  { %v1299_v63 = vld [vmem:[#allocation0 + $0x3c1] ss:$8 sm:$0xf0]   ;;  %v843_v5 = vpop.permute.xlu1 %842  }
  0xa7   :  { %v1301_v1 = vsel %vm643_vm0, %v1299_v63, %v1297_v62  ;;  %1579 = vst.msk [vmem:[%s2389_s1 + $0x28] sm:$0xff] %vm790_vm2, %v843_v5  }
  0xa8   :  { %1269 = vrot.lane.b32.xlu0 %v1268_v54, %s1625_s16 }
  0xa9   :  { %1258 = vrot.lane.b32.xlu1 %v1257_v53, %s1625_s16 }
  0xab   :  { %v854_v6 = vpop.permute.xlu0 %853  }
  0xac   :  { %1291 = vrot.lane.b32.xlu0 %v1290_v61, %s1625_s16  ;;  %1580 = vst.msk [vmem:[%s2389_s1 + $0x48] sm:$0xff] %vm790_vm2, %v854_v6  }
  0xad   :  { %1280 = vrot.lane.b32.xlu1 %v1279_v60, %s1625_s16 }
  0xb1   :  { %1302 = vrot.lane.b32.xlu1 %v1301_v1, %s1625_s16  ;;  %v865_v7 = vpop.permute.xlu1 %864  }
  0xb2   :  { %1581 = vst.msk [vmem:[%s2389_s1 + $0x68] sm:$0xff] %vm790_vm2, %v865_v7  }
  0xba   :  { %v876_v8 = vpop.permute.xlu0 %875  }
  0xbb   :  { %1582 = vst.msk [vmem:[%s2389_s1 + $0x10] sm:$0xff] %vm790_vm2, %v876_v8  }
  0xc1   :  { %v887_v9 = vpop.permute.xlu1 %886  }
  0xc2   :  { %1583 = vst.msk [vmem:[%s2389_s1 + $0x30] sm:$0xff] %vm790_vm2, %v887_v9  }
  0xc5   :  { %v898_v10 = vpop.permute.xlu0 %897  }
  0xc6   :  { %1584 = vst.msk [vmem:[%s2389_s1 + $0x50] sm:$0xff] %vm790_vm2, %v898_v10  }
  0xcc   :  { %v909_v11 = vpop.permute.xlu1 %908  }
  0xcd   :  { %1585 = vst.msk [vmem:[%s2389_s1 + $0x70] sm:$0xff] %vm790_vm2, %v909_v11  }
  0xd5   :  { %v920_v12 = vpop.permute.xlu0 %919  }
  0xd6   :  { %1586 = vst.msk [vmem:[%s2389_s1 + $0x18] sm:$0xff] %vm790_vm2, %v920_v12  }
  0xdc   :  { %v931_v13 = vpop.permute.xlu1 %930  }
  0xdd   :  { %1587 = vst.msk [vmem:[%s2389_s1 + $0x38] sm:$0xff] %vm790_vm2, %v931_v13  }
  0xde   :  { %v942_v14 = vpop.permute.xlu0 %941  }
  0xdf   :  { %1588 = vst.msk [vmem:[%s2389_s1 + $0x58] sm:$0xff] %vm790_vm2, %v942_v14  }
  0xe2   :  { %v964_v16 = vpop.permute.xlu0 %963  }
  0xe3   :  { %v953_v15 = vpop.permute.xlu1 %952   ;;  %966 = vst.msk [vmem:[%s2389_s1] sm:$0xff] %vm965_vm3, %v964_v16  }
  0xe4   :  { %1589 = vst.msk [vmem:[%s2389_s1 + $0x78] sm:$0xff] %vm790_vm2, %v953_v15  }
  0xe6   :  { %v985_v18 = vpop.permute.xlu0 %984  }
  0xe7   :  { %v974_v17 = vpop.permute.xlu1 %973   ;;  %1591 = vst.msk [vmem:[%s2389_s1 + $0x40] sm:$0xff] %vm965_vm3, %v985_v18  }
  0xe8   :  { %1590 = vst.msk [vmem:[%s2389_s1 + $0x20] sm:$0xff] %vm965_vm3, %v974_v17  }
  0xea   :  { %v1007_v20 = vpop.permute.xlu0 %1006  }
  0xeb   :  { %v996_v19 = vpop.permute.xlu1 %995   ;;  %1593 = vst.msk [vmem:[%s2389_s1 + $0x8] sm:$0xff] %vm965_vm3, %v1007_v20  }
  0xec   :  { %1592 = vst.msk [vmem:[%s2389_s1 + $0x60] sm:$0xff] %vm965_vm3, %v996_v19  }
  0xee   :  { %v1029_v22 = vpop.permute.xlu0 %1028  }
  0xef   :  { %v1018_v21 = vpop.permute.xlu1 %1017   ;;  %1595 = vst.msk [vmem:[%s2389_s1 + $0x48] sm:$0xff] %vm965_vm3, %v1029_v22  }
  0xf0   :  { %1594 = vst.msk [vmem:[%s2389_s1 + $0x28] sm:$0xff] %vm965_vm3, %v1018_v21  }
  0xf2   :  { %v1051_v24 = vpop.permute.xlu0 %1050  }
  0xf3   :  { %v1040_v23 = vpop.permute.xlu1 %1039   ;;  %1597 = vst.msk [vmem:[%s2389_s1 + $0x10] sm:$0xff] %vm965_vm3, %v1051_v24  }
  0xf4   :  { %1596 = vst.msk [vmem:[%s2389_s1 + $0x68] sm:$0xff] %vm965_vm3, %v1040_v23  }
  0xf6   :  { %v1073_v26 = vpop.permute.xlu0 %1072  }
  0xf7   :  { %v1062_v25 = vpop.permute.xlu1 %1061   ;;  %1599 = vst.msk [vmem:[%s2389_s1 + $0x50] sm:$0xff] %vm965_vm3, %v1073_v26  }
  0xf8   :  { %1598 = vst.msk [vmem:[%s2389_s1 + $0x30] sm:$0xff] %vm965_vm3, %v1062_v25  }
  0xfa   :  { %v1095_v28 = vpop.permute.xlu0 %1094  }
  0xfb   :  { %v1084_v27 = vpop.permute.xlu1 %1083   ;;  %1601 = vst.msk [vmem:[%s2389_s1 + $0x18] sm:$0xff] %vm965_vm3, %v1095_v28  }
  0xfc   :  { %1600 = vst.msk [vmem:[%s2389_s1 + $0x70] sm:$0xff] %vm965_vm3, %v1084_v27  }
  0xfe   :  { %v1117_v30 = vpop.permute.xlu0 %1116  }
  0xff   :  { %v1106_v29 = vpop.permute.xlu1 %1105   ;;  %1603 = vst.msk [vmem:[%s2389_s1 + $0x58] sm:$0xff] %vm965_vm3, %v1117_v30  }
 0x100   :  { %1602 = vst.msk [vmem:[%s2389_s1 + $0x38] sm:$0xff] %vm965_vm3, %v1106_v29  }
 0x102   :  { %v1139_v32 = vpop.permute.xlu0 %1138  }
 0x103   :  { %v1128_v31 = vpop.permute.xlu1 %1127   ;;  %1141 = vst.msk [vmem:[%s2389_s1] sm:$0xff] %vm1140_vm4, %v1139_v32  }
 0x104   :  { %1604 = vst.msk [vmem:[%s2389_s1 + $0x78] sm:$0xff] %vm965_vm3, %v1128_v31  }
 0x106   :  { %v1160_v34 = vpop.permute.xlu0 %1159  }
 0x107   :  { %v1149_v33 = vpop.permute.xlu1 %1148   ;;  %1606 = vst.msk [vmem:[%s2389_s1 + $0x40] sm:$0xff] %vm1140_vm4, %v1160_v34  }
 0x108   :  { %1605 = vst.msk [vmem:[%s2389_s1 + $0x20] sm:$0xff] %vm1140_vm4, %v1149_v33  }
 0x10a   :  { %v1182_v36 = vpop.permute.xlu0 %1181  }
 0x10b   :  { %v1171_v35 = vpop.permute.xlu1 %1170   ;;  %1608 = vst.msk [vmem:[%s2389_s1 + $0x8] sm:$0xff] %vm1140_vm4, %v1182_v36  }
 0x10c   :  { %1607 = vst.msk [vmem:[%s2389_s1 + $0x60] sm:$0xff] %vm1140_vm4, %v1171_v35  }
 0x10e   :  { %v1204_v38 = vpop.permute.xlu0 %1203  }
 0x10f   :  { %v1193_v37 = vpop.permute.xlu1 %1192   ;;  %1610 = vst.msk [vmem:[%s2389_s1 + $0x48] sm:$0xff] %vm1140_vm4, %v1204_v38  }
 0x110   :  { %1609 = vst.msk [vmem:[%s2389_s1 + $0x28] sm:$0xff] %vm1140_vm4, %v1193_v37  }
 0x112   :  { %v1226_v40 = vpop.permute.xlu0 %1225  }
 0x113   :  { %v1215_v39 = vpop.permute.xlu1 %1214   ;;  %1612 = vst.msk [vmem:[%s2389_s1 + $0x10] sm:$0xff] %vm1140_vm4, %v1226_v40  }
 0x114   :  { %1611 = vst.msk [vmem:[%s2389_s1 + $0x68] sm:$0xff] %vm1140_vm4, %v1215_v39  }
 0x116   :  { %v1248_v42 = vpop.permute.xlu0 %1247  }
 0x117   :  { %v1237_v41 = vpop.permute.xlu1 %1236   ;;  %1614 = vst.msk [vmem:[%s2389_s1 + $0x50] sm:$0xff] %vm1140_vm4, %v1248_v42  }
 0x118   :  { %1613 = vst.msk [vmem:[%s2389_s1 + $0x30] sm:$0xff] %vm1140_vm4, %v1237_v41  }
 0x11a   :  { %v1270_v44 = vpop.permute.xlu0 %1269  }
 0x11b   :  { %v1259_v43 = vpop.permute.xlu1 %1258   ;;  %1616 = vst.msk [vmem:[%s2389_s1 + $0x18] sm:$0xff] %vm1140_vm4, %v1270_v44  }
 0x11c   :  { %1615 = vst.msk [vmem:[%s2389_s1 + $0x70] sm:$0xff] %vm1140_vm4, %v1259_v43  }
 0x11e   :  { %v1292_v46 = vpop.permute.xlu0 %1291  }
 0x11f   :  { %v1281_v45 = vpop.permute.xlu1 %1280   ;;  %1618 = vst.msk [vmem:[%s2389_s1 + $0x58] sm:$0xff] %vm1140_vm4, %v1292_v46  }
 0x120   :  { %1617 = vst.msk [vmem:[%s2389_s1 + $0x38] sm:$0xff] %vm1140_vm4, %v1281_v45  }
 0x123   :  { %v1303_v47 = vpop.permute.xlu1 %1302  }
 0x124   :  { %1619 = vst.msk [vmem:[%s2389_s1 + $0x78] sm:$0xff] %vm1140_vm4, %v1303_v47  }

// kernel: upsample_conv_transpose2d.1
= control target key start
LH: loop header
LB: loop body
LE: loop exit
PB: predicated region body
PF: predicated region fallthrough
CT: control target
= control target key end

     0   :  { %9 = vsyncpa [#allocation4], 0  ;;  %s1681_s0 = inlined_call_operand.vmem [shape: f32[2,4,16,32], index: 0, kind: input, shape index: {}]   ;;  %s1682_s1 = inlined_call_operand.vmem [shape: f32[128,32], index: 1, kind: input, shape index: {}]   ;;  %s1683_s2 = inlined_call_operand.vmem [shape: f32[128,32], index: 2, kind: input, shape index: {}]   ;;  %s1684_s3 = inlined_call_operand.vmem [shape: f32[128,1], index: 3, kind: input, shape index: {}]   ;;  %s1685_s4 = inlined_call_operand.hbm [shape: f32[2,8,32,32], index: 4, kind: output, shape index: {}]  }
   0x1   :  { %11 = vsyncpa [#allocation4 + $0x1], 0  ;;  %s1296_s15 = smov 0   ;;  %s1298_s16 = smov 0  }
   0x2   :  { %s1300_s17 = smov 0   ;;  %s1302_s18 = smov 0  }
   0x3   :  { %s1304_s19 = smov 0   ;;  %s1306_s20 = smov 0  }
   0x4   :  { %s1308_s21 = smov 0   ;;  %s1310_s22 = smov 0  }
   0x5 LB: > { %s956_s23 = sadd.s32 4294967295, %s1261_s22   ;;  %s957_s24 = sadd.s32 4294967294, %s1261_s22   ;;  %s1261_s22 = sphi %s1310_s22, %s17_s22   ;;  %s1257_s21 = sphi %s1308_s21, %s1697_s21   ;;  %s1253_s20 = sphi %s1306_s20, %s1696_s20   ;;  %s1249_s19 = sphi %s1304_s19, %s1695_s19   ;;  %s1245_s18 = sphi %s1302_s18, %s1694_s18   ;;  %s1241_s17 = sphi %s1300_s17, %s1693_s17   ;;  %s1237_s16 = sphi %s1298_s16, %s1692_s16   ;;  %s1233_s15 = sphi %s1296_s15, %s1691_s15  }
   0x6   : > { %s26_s25 = sadd.s32 1, %s1253_s20  ;;  %s29_s26 = sadd.s32 1, %s1257_s21 }
   0x7   : > { %p27_p0 = scmp.ge.s32.totalorder %s26_s25, 2  ;;  %p45_p1 = scmp.ne.s32.totalorder %s1241_s17, %s1237_s16 }
   0x8   : > { %p46_p2 = scmp.eq.s32.totalorder %s1261_s22, 0  ;;  %p140_p5 = scmp.eq.s32.totalorder %s956_s23, 3 }
   0x9   : > { %s1699_s25 = smov (%p27_p0, %s26_s25), 0  ;;  %s1701_s26 = smov (!%p27_p0, %s29_s26), %s1257_s21 }
   0xa   : > { %s34_s27 = ssub.s32 %s1253_s20, %s1699_s25  ;;  %p1348_p3 = por %p46_p2, %p45_p1 }
   0xb   : > { %p31_p4 = scmp.ge.s32.totalorder %s1701_s26, 2  ;;  %p145_p6 = scmp.ne.s32.totalorder %s1237_s16, %s1233_s15 }
   0xc   : > { %p146_p7 = scmp.eq.s32.totalorder %s957_s24, 3  ;;  %p1356_p8 = por %p140_p5, %p45_p1 }
   0xd   : > { %s1703_s26 = smov (%p31_p4, %s1701_s26), 0  ;;  %s38_s7 = sadd.s32 1, %s1241_s17 }
   0xe   : > { %p1360_p9 = por %p146_p7, %p145_p6  ;;  %s33_s5 = ssub.s32 %s1257_s21, %s1703_s26 }
   0xf   : > { %s35_s6 = sor.u32 %s34_s27, %s33_s5  ;;  %p959_p11 = scmp.ge.s32.totalorder %s1261_s22, 4 }
  0x10   : > { %p36_p10 = scmp.eq.s32.totalorder %s35_s6, 0 }
  0x11   : > { %171 = sbr.rel (%p959_p11) target bundleno = 30 (0x1e), region = 28 }
  0x12   : > { %s1368_s8 = scalar_select %p36_p10, %s1241_s17, %s38_s7  }
  0x16   : > { %174 = sbr.rel (!%p1348_p3) target bundleno = 30 (0x1e), region = 32  ;;  %s176_s9 = sand.u32 (%p1348_p3), 1, %s1241_s17  }
  0x17   : > { %s961_s10 = sshll.u32 (%p1348_p3), %s1257_s21, 3  ;;  %s960_s11 = sshll.u32 (%p1348_p3), %s176_s9, 5 }
  0x18   : > { %s180_s12 = sadd.s32 (%p1348_p3), %s1253_s20, %s961_s10  ;;  %s178_s27 = scalar_lea.vmem (%p1348_p3), [#allocation2], %s960_s11 }
  0x19   : > { %s962_s13 = sshll.u32 (%p1348_p3), %s180_s12, 3 }
  0x1a   : > { %s182_s24 = scalar_lea.vmem (%p1348_p3), %s1681_s0, %s962_s13 }
  0x1b   : > { %v217_v0 = vld [vmem:[%s182_s24] sm:$0xff]  ;;  %v219_v1 = vld [vmem:[%s182_s24 + $0x10] sm:$0xff] }
  0x1c   : > { %v221_v2 = vld [vmem:[%s182_s24 + $0x20] sm:$0xff]  ;;  %218 = vst [vmem:[%s178_s27] sm:$0xff] %v217_v0  ;;  %220 = vst [vmem:[%s178_s27 + $0x8] sm:$0xff] %v219_v1  ;;  %v223_v3 = vld [vmem:[%s182_s24 + $0x30] sm:$0xff] }
  0x1d   : > { %222 = vst [vmem:[%s178_s27 + $0x10] sm:$0xff] %v221_v2  ;;  %224 = vst [vmem:[%s178_s27 + $0x18] sm:$0xff] %v223_v3 }
  0x1e PF: > { %p963_p12 = scmp.ge.s32.totalorder %s1261_s22, 1  ;;  %p229_p13 = scmp.lt.s32.totalorder %s1261_s22, 5 }
  0x20   : > { %p230_p0 = pnand %p963_p12, %p229_p13 }
  0x21   : > { %s1382_s28 = sand.u32 (!%p230_p0), 1, %s1237_s16  }
  0x22   : > { %233 = sbr.rel (%p230_p0) target bundleno = 288 (0x120), region = 70  ;;  %s964_s10 = sshll.u32 (!%p230_p0), %s1382_s28, 5 }
  0x23   : > { %s238_s11 = scalar_lea.vmem (!%p230_p0), [#allocation2], %s964_s10  ;;  %s965_s7 = sshll.u32 (!%p230_p0), %s1382_s28, 7 }
  0x24   : > { %s1570_s9 = scalar_lea.vmem (!%p230_p0), [#allocation3], %s965_s7  ;;  %s834_s10 = scalar_lea.sflag (!%p230_p0), [#allocation4], %s1382_s28 }
  0x27   : > { %v266_v4 = vld [vmem:[%s1682_s1] sm:$0xff]  ;;  %vm282_vm0 = vcmask 261120   ;;  %v1263_v6 = vmov 0   ;;  %v265_v7 = vld [vmem:[%s238_s11 + $0x18] sm:$0xff]  ;;  %v264_v8 = vld [vmem:[%s238_s11 + $0x10] sm:$0xff]  ;;  %v685_v57 = vlaneseq }
  0x28   : > { %v476_v5 = vld [vmem:[%s1683_s2] sm:$0xff]  ;;  %1052 = vmatprep.mubr.msk.f32.mxu0 %vm282_vm0, %v266_v4  ;;  %1194 = vset.pattern.permute.xlu1 %v1263_v6  ;;  %v263_v9 = vld [vmem:[%s238_s11 + $0x8] sm:$0xff]  ;;  %v268_v13 = vld [vmem:[%s1682_s1 + $0x10] sm:$0xff] }
  0x29   : > { %1084 = vmatprep.mubr.msk.f32.mxu1 %vm282_vm0, %v476_v5  ;;  %1193 = vset.pattern.permute.xlu0 %v1263_v6  ;;  %v262_v10 = vld [vmem:[%s238_s11] sm:$0xff]  ;;  %v267_v11 = vld [vmem:[%s1682_s1 + $0x8] sm:$0xff]  ;;  %v478_v14 = vld [vmem:[%s1683_s2 + $0x10] sm:$0xff]  ;;  %v686_v60 = vand.u32 127, %v685_v57 }
  0x2a   : > { %1044 = vmatprep.subr.mxu0 %v265_v7  ;;  %1076 = vmatprep.subr.mxu1 %v265_v7  ;;  %v477_v12 = vld [vmem:[%s1683_s2 + $0x8] sm:$0xff]  ;;  %v707_v15 = vld [vmem:[%s1684_s3 + $0x10] sm:$0xff]  ;;  %v705_v16 = vld [vmem:[%s1684_s3] sm:$0xff] }
  0x2b   : > { %1045 = vmatpush3.msra.mxu0 %v265_v7  ;;  %1077 = vmatpush3.msra.mxu1 %v265_v7  ;;  %v269_v17 = vld [vmem:[%s1682_s1 + $0x18] sm:$0xff]  ;;  %v270_v19 = vld [vmem:[%s1682_s1 + $0x20] sm:$0xff]  ;;  %v706_v22 = vld [vmem:[%s1684_s3 + $0x8] sm:$0xff]  ;;  %v687_v62 = vand.u32 1, %v686_v60 }
  0x2c   : > { %1046 = vmatprep.subr.mxu0 %v264_v8  ;;  %1078 = vmatprep.subr.mxu1 %v264_v8  ;;  %v479_v18 = vld [vmem:[%s1683_s2 + $0x18] sm:$0xff]  ;;  %v480_v20 = vld [vmem:[%s1683_s2 + $0x20] sm:$0xff]  ;;  %v271_v23 = vld [vmem:[%s1682_s1 + $0x28] sm:$0xff] }
  0x2d   : > { %1047 = vmatpush3.msra.mxu0 %v264_v8  ;;  %1079 = vmatpush3.msra.mxu1 %v264_v8  ;;  %v708_v21 = vld [vmem:[%s1684_s3 + $0x18] sm:$0xff]  ;;  %v481_v24 = vld [vmem:[%s1683_s2 + $0x28] sm:$0xff]  ;;  %v272_v25 = vld [vmem:[%s1682_s1 + $0x30] sm:$0xff]  ;;  %vm1562_vm1 = vcmp.eq.s32.totalorder %v687_v62, 0 }
  0x2e   : > { %1048 = vmatprep.subr.mxu0 %v263_v9  ;;  %1080 = vmatprep.subr.mxu1 %v263_v9  ;;  %v482_v26 = vld [vmem:[%s1683_s2 + $0x30] sm:$0xff]  ;;  %v710_v27 = vld [vmem:[%s1684_s3 + $0x28] sm:$0xff]  ;;  %v709_v28 = vld [vmem:[%s1684_s3 + $0x20] sm:$0xff] }
  0x2f   : > { %1049 = vmatpush3.msra.mxu0 %v263_v9  ;;  %1081 = vmatpush3.msra.mxu1 %v263_v9  ;;  %v273_v29 = vld [vmem:[%s1682_s1 + $0x38] sm:$0xff]  ;;  %v274_v31 = vld [vmem:[%s1682_s1 + $0x40] sm:$0xff]  ;;  %v711_v34 = vld [vmem:[%s1684_s3 + $0x30] sm:$0xff] }
  0x30   : > { %1050 = vmatprep.subr.mxu0 %v262_v10  ;;  %1082 = vmatprep.subr.mxu1 %v262_v10  ;;  %v483_v30 = vld [vmem:[%s1683_s2 + $0x38] sm:$0xff]  ;;  %v484_v32 = vld [vmem:[%s1683_s2 + $0x40] sm:$0xff]  ;;  %v275_v35 = vld [vmem:[%s1682_s1 + $0x48] sm:$0xff] }
  0x31   : > { %1051 = vmatpush3.msra.mxu0 %v262_v10  ;;  %1083 = vmatpush3.msra.mxu1 %v262_v10  ;;  %v712_v33 = vld [vmem:[%s1684_s3 + $0x38] sm:$0xff]  ;;  %v485_v36 = vld [vmem:[%s1683_s2 + $0x48] sm:$0xff]  ;;  %v276_v37 = vld [vmem:[%s1682_s1 + $0x50] sm:$0xff] }
  0x32   : > { %1053 = vmatmul.mubr.msk.f32.vlgmr.msra.gmra.mxu0 %vm282_vm0, %v267_v11  ;;  %1085 = vmatmul.mubr.msk.f32.vlgmr.msra.gmra.mxu1 %vm282_vm0, %v477_v12  ;;  %v486_v38 = vld [vmem:[%s1683_s2 + $0x50] sm:$0xff]  ;;  %v714_v39 = vld [vmem:[%s1684_s3 + $0x48] sm:$0xff]  ;;  %v713_v40 = vld [vmem:[%s1684_s3 + $0x40] sm:$0xff] }
  0x33   : > { %1055 = vmatprep.mubr.msk.f32.mxu0 %vm282_vm0, %v268_v13  ;;  %1087 = vmatprep.mubr.msk.f32.mxu1 %vm282_vm0, %v478_v14  ;;  %v277_v41 = vld [vmem:[%s1682_s1 + $0x58] sm:$0xff]  ;;  %v278_v43 = vld [vmem:[%s1682_s1 + $0x60] sm:$0xff]  ;;  %v715_v46 = vld [vmem:[%s1684_s3 + $0x50] sm:$0xff] }
  0x34   : > { %733 = vperm.xlu1 %1194, %v707_v15   ;;  %723 = vperm.xlu0 %1193, %v705_v16   ;;  %v487_v42 = vld [vmem:[%s1683_s2 + $0x58] sm:$0xff]  ;;  %v488_v44 = vld [vmem:[%s1683_s2 + $0x60] sm:$0xff]  ;;  %v279_v47 = vld [vmem:[%s1682_s1 + $0x68] sm:$0xff] }
  0x35   : > { %v716_v45 = vld [vmem:[%s1684_s3 + $0x58] sm:$0xff]  ;;  %v489_v48 = vld [vmem:[%s1683_s2 + $0x68] sm:$0xff]  ;;  %v280_v49 = vld [vmem:[%s1682_s1 + $0x70] sm:$0xff] }
  0x36   : > { %1056 = vmatmul.mubr.msk.f32.gmra.mxu0 %vm282_vm0, %v269_v17  ;;  %1088 = vmatmul.mubr.msk.f32.gmra.mxu1 %vm282_vm0, %v479_v18  ;;  %v490_v50 = vld [vmem:[%s1683_s2 + $0x70] sm:$0xff]  ;;  %v718_v51 = vld [vmem:[%s1684_s3 + $0x68] sm:$0xff]  ;;  %v717_v52 = vld [vmem:[%s1684_s3 + $0x60] sm:$0xff] }
  0x37   : > { %1058 = vmatprep.mubr.msk.f32.mxu0 %vm282_vm0, %v270_v19  ;;  %1090 = vmatprep.mubr.msk.f32.mxu1 %vm282_vm0, %v480_v20  ;;  %v281_v53 = vld [vmem:[%s1682_s1 + $0x78] sm:$0xff]  ;;  %v719_v56 = vld [vmem:[%s1684_s3 + $0x70] sm:$0xff] }
  0x38   : > { %738 = vperm.xlu1 %1194, %v708_v21   ;;  %728 = vperm.xlu0 %1193, %v706_v22   ;;  %v491_v54 = vld [vmem:[%s1683_s2 + $0x78] sm:$0xff] }
  0x39   : > { %v720_v55 = vld [vmem:[%s1684_s3 + $0x78] sm:$0xff] }
  0x3a   : > { %1059 = vmatmul.mubr.msk.f32.gmra.mxu0 %vm282_vm0, %v271_v23  ;;  %1091 = vmatmul.mubr.msk.f32.gmra.mxu1 %vm282_vm0, %v481_v24 }
  0x3b   : > { %1061 = vmatprep.mubr.msk.f32.mxu0 %vm282_vm0, %v272_v25  ;;  %1093 = vmatprep.mubr.msk.f32.mxu1 %vm282_vm0, %v482_v26 }
  0x3c   : > { %748 = vperm.xlu1 %1194, %v710_v27   ;;  %743 = vperm.xlu0 %1193, %v709_v28  }
  0x3e   : > { %1062 = vmatmul.mubr.msk.f32.gmra.mxu0 %vm282_vm0, %v273_v29  ;;  %1094 = vmatmul.mubr.msk.f32.gmra.mxu1 %vm282_vm0, %v483_v30 }
  0x3f   : > { %1064 = vmatprep.mubr.msk.f32.mxu0 %vm282_vm0, %v274_v31  ;;  %1096 = vmatprep.mubr.msk.f32.mxu1 %vm282_vm0, %v484_v32 }
  0x40   : > { %758 = vperm.xlu1 %1194, %v712_v33   ;;  %753 = vperm.xlu0 %1193, %v711_v34  }
  0x42   : > { %1065 = vmatmul.mubr.msk.f32.gmra.mxu0 %vm282_vm0, %v275_v35  ;;  %1097 = vmatmul.mubr.msk.f32.gmra.mxu1 %vm282_vm0, %v485_v36 }
  0x43   : > { %1067 = vmatprep.mubr.msk.f32.mxu0 %vm282_vm0, %v276_v37  ;;  %1099 = vmatprep.mubr.msk.f32.mxu1 %vm282_vm0, %v486_v38 }
  0x44   : > { %768 = vperm.xlu1 %1194, %v714_v39   ;;  %763 = vperm.xlu0 %1193, %v713_v40  }
  0x46   : > { %1068 = vmatmul.mubr.msk.f32.gmra.mxu0 %vm282_vm0, %v277_v41  ;;  %1100 = vmatmul.mubr.msk.f32.gmra.mxu1 %vm282_vm0, %v487_v42 }
  0x47   : > { %1070 = vmatprep.mubr.msk.f32.mxu0 %vm282_vm0, %v278_v43  ;;  %1102 = vmatprep.mubr.msk.f32.mxu1 %vm282_vm0, %v488_v44 }
  0x48   : > { %778 = vperm.xlu1 %1194, %v716_v45   ;;  %773 = vperm.xlu0 %1193, %v715_v46  }
  0x4a   : > { %1071 = vmatmul.mubr.msk.f32.gmra.mxu0 %vm282_vm0, %v279_v47  ;;  %1103 = vmatmul.mubr.msk.f32.gmra.mxu1 %vm282_vm0, %v489_v48 }
  0x4b   : > { %1073 = vmatprep.mubr.msk.f32.mxu0 %vm282_vm0, %v280_v49  ;;  %1105 = vmatprep.mubr.msk.f32.mxu1 %vm282_vm0, %v490_v50 }
  0x4c   : > { %788 = vperm.xlu1 %1194, %v718_v51   ;;  %783 = vperm.xlu0 %1193, %v717_v52  }
  0x4e   : > { %1074 = vmatmul.mubr.msk.f32.gmra.mxu0 %vm282_vm0, %v281_v53  ;;  %1106 = vmatmul.mubr.msk.f32.gmra.mxu1 %vm282_vm0, %v491_v54 }
  0x50   : > { %798 = vperm.xlu1 %1194, %v720_v55   ;;  %793 = vperm.xlu0 %1193, %v719_v56  }
  0xaf   : > { %v734_v58 = vpop.permute.xlu1 %733  ;;  %v724_v59 = vpop.permute.xlu0 %723 }
  0xb3   : > { %v739_v61 = vpop.permute.xlu1 %738  ;;  %v729_v63 = vpop.permute.xlu0 %728 }
  0xb7   : > { %v749_v1 = vpop.permute.xlu1 %748  ;;  %v744_v4 = vpop.permute.xlu0 %743 }
  0xbb   : > { %v759_v13 = vpop.permute.xlu1 %758  ;;  %v754_v18 = vpop.permute.xlu0 %753 }
  0xbf   : > { %v769_v27 = vpop.permute.xlu1 %768  ;;  %v764_v32 = vpop.permute.xlu0 %763 }
  0xc3   : > { %v779_v41 = vpop.permute.xlu1 %778  ;;  %v774_v46 = vpop.permute.xlu0 %773 }
  0xc7   : > { %v789_v55 = vpop.permute.xlu1 %788  ;;  %v784_v60 = vpop.permute.xlu0 %783 }
  0xf2   : > { %v1054_v2 = vpop.f32.mrf.mxu0  ;;  %v1086_v3 = vpop.f32.mrf.mxu1 }
  0xf3   : > { %v690_v5 = vsel %vm1562_vm1, %v1054_v2, %v1086_v3 }
  0xf4   : > { %v802_v6 = vadd.f32 %v729_v63, %v690_v5  ;;  %v397_v7 = vpop.f32.mrf.mxu0  ;;  %v606_v8 = vpop.f32.mrf.mxu1 }
  0xf5   : > { %v689_v9 = vsel %vm1562_vm1, %v397_v7, %v606_v8 }
  0xf6   : > { %818 = vst.msk [vmem:[%s1570_s9 + $0x8] sm:$0xff] %vm282_vm0, %v802_v6  ;;  %v801_v10 = vadd.f32 %v724_v59, %v689_v9  ;;  %v1057_v11 = vpop.f32.mrf.mxu0  ;;  %v1089_v12 = vpop.f32.mrf.mxu1 }
  0xf7   : > { %v692_v14 = vsel %vm1562_vm1, %v1057_v11, %v1089_v12  ;;  %v799_v6 = vpop.permute.xlu1 %798  ;;  %v794_v11 = vpop.permute.xlu0 %793 }
  0xf8   : > { %817 = vst.msk [vmem:[%s1570_s9] sm:$0xff] %vm282_vm0, %v801_v10  ;;  %v804_v15 = vadd.f32 %v739_v61, %v692_v14  ;;  %v407_v16 = vpop.f32.mrf.mxu0  ;;  %v616_v17 = vpop.f32.mrf.mxu1 }
  0xf9   : > { %v691_v19 = vsel %vm1562_vm1, %v407_v16, %v616_v17 }
  0xfa   : > { %820 = vst.msk [vmem:[%s1570_s9 + $0x18] sm:$0xff] %vm282_vm0, %v804_v15  ;;  %v803_v20 = vadd.f32 %v734_v58, %v691_v19  ;;  %v1060_v21 = vpop.f32.mrf.mxu0  ;;  %v1092_v22 = vpop.f32.mrf.mxu1 }
  0xfb   : > { %v694_v23 = vsel %vm1562_vm1, %v1060_v21, %v1092_v22 }
  0xfc   : > { %819 = vst.msk [vmem:[%s1570_s9 + $0x10] sm:$0xff] %vm282_vm0, %v803_v20  ;;  %v806_v24 = vadd.f32 %v749_v1, %v694_v23  ;;  %v417_v25 = vpop.f32.mrf.mxu0  ;;  %v626_v26 = vpop.f32.mrf.mxu1 }
  0xfd   : > { %v693_v28 = vsel %vm1562_vm1, %v417_v25, %v626_v26 }
  0xfe   : > { %822 = vst.msk [vmem:[%s1570_s9 + $0x28] sm:$0xff] %vm282_vm0, %v806_v24  ;;  %v805_v29 = vadd.f32 %v744_v4, %v693_v28  ;;  %v1063_v30 = vpop.f32.mrf.mxu0  ;;  %v1095_v31 = vpop.f32.mrf.mxu1 }
  0xff   : > { %v696_v33 = vsel %vm1562_vm1, %v1063_v30, %v1095_v31 }
 0x100   : > { %821 = vst.msk [vmem:[%s1570_s9 + $0x20] sm:$0xff] %vm282_vm0, %v805_v29  ;;  %v808_v34 = vadd.f32 %v759_v13, %v696_v33  ;;  %v427_v35 = vpop.f32.mrf.mxu0  ;;  %v636_v36 = vpop.f32.mrf.mxu1 }
 0x101   : > { %v695_v37 = vsel %vm1562_vm1, %v427_v35, %v636_v36 }
 0x102   : > { %824 = vst.msk [vmem:[%s1570_s9 + $0x38] sm:$0xff] %vm282_vm0, %v808_v34  ;;  %v807_v38 = vadd.f32 %v754_v18, %v695_v37  ;;  %v1066_v39 = vpop.f32.mrf.mxu0  ;;  %v1098_v40 = vpop.f32.mrf.mxu1 }
 0x103   : > { %v698_v42 = vsel %vm1562_vm1, %v1066_v39, %v1098_v40 }
 0x104   : > { %823 = vst.msk [vmem:[%s1570_s9 + $0x30] sm:$0xff] %vm282_vm0, %v807_v38  ;;  %v810_v43 = vadd.f32 %v769_v27, %v698_v42  ;;  %v437_v44 = vpop.f32.mrf.mxu0  ;;  %v646_v45 = vpop.f32.mrf.mxu1 }
 0x105   : > { %v697_v47 = vsel %vm1562_vm1, %v437_v44, %v646_v45 }
 0x106   : > { %826 = vst.msk [vmem:[%s1570_s9 + $0x48] sm:$0xff] %vm282_vm0, %v810_v43  ;;  %v809_v48 = vadd.f32 %v764_v32, %v697_v47  ;;  %v1069_v49 = vpop.f32.mrf.mxu0  ;;  %v1101_v50 = vpop.f32.mrf.mxu1 }
 0x107   : > { %v700_v51 = vsel %vm1562_vm1, %v1069_v49, %v1101_v50 }
 0x108   : > { %825 = vst.msk [vmem:[%s1570_s9 + $0x40] sm:$0xff] %vm282_vm0, %v809_v48  ;;  %v812_v52 = vadd.f32 %v779_v41, %v700_v51  ;;  %v447_v53 = vpop.f32.mrf.mxu0  ;;  %v656_v54 = vpop.f32.mrf.mxu1 }
 0x109   : > { %v699_v56 = vsel %vm1562_vm1, %v447_v53, %v656_v54 }
 0x10a   : > { %828 = vst.msk [vmem:[%s1570_s9 + $0x58] sm:$0xff] %vm282_vm0, %v812_v52  ;;  %v811_v57 = vadd.f32 %v774_v46, %v699_v56  ;;  %v1072_v58 = vpop.f32.mrf.mxu0  ;;  %v1104_v59 = vpop.f32.mrf.mxu1 }
 0x10b   : > { %v702_v61 = vsel %vm1562_vm1, %v1072_v58, %v1104_v59 }
 0x10c   : > { %827 = vst.msk [vmem:[%s1570_s9 + $0x50] sm:$0xff] %vm282_vm0, %v811_v57  ;;  %v814_v62 = vadd.f32 %v789_v55, %v702_v61  ;;  %v457_v63 = vpop.f32.mrf.mxu0  ;;  %v666_v1 = vpop.f32.mrf.mxu1 }
 0x10d   : > { %v701_v2 = vsel %vm1562_vm1, %v457_v63, %v666_v1 }
 0x10e   : > { %830 = vst.msk [vmem:[%s1570_s9 + $0x68] sm:$0xff] %vm282_vm0, %v814_v62  ;;  %v813_v3 = vadd.f32 %v784_v60, %v701_v2  ;;  %v1075_v4 = vpop.f32.mrf.mxu0  ;;  %v1107_v5 = vpop.f32.mrf.mxu1 }
 0x10f   : > { %v704_v7 = vsel %vm1562_vm1, %v1075_v4, %v1107_v5 }
 0x110   : > { %829 = vst.msk [vmem:[%s1570_s9 + $0x60] sm:$0xff] %vm282_vm0, %v813_v3  ;;  %v816_v8 = vadd.f32 %v799_v6, %v704_v7  ;;  %v467_v9 = vpop.f32.mrf.mxu0  ;;  %v676_v10 = vpop.f32.mrf.mxu1 }
 0x111   : > { %v703_v12 = vsel %vm1562_vm1, %v467_v9, %v676_v10 }
 0x112   : > { %832 = vst.msk [vmem:[%s1570_s9 + $0x78] sm:$0xff] %vm282_vm0, %v816_v8  ;;  %v815_v13 = vadd.f32 %v794_v11, %v703_v12 }
 0x114   : > { %831 = vst.msk [vmem:[%s1570_s9 + $0x70] sm:$0xff] %vm282_vm0, %v815_v13 }
 0x115   : > { %s999_s11 = sshll.u32 %s1245_s18, 1  ;;  %s1000_s12 = sshll.u32 %s1249_s19, 5 }
 0x116   : > { %s846_s13 = sadd.s32 %s1000_s12, %s999_s11  ;;  %s859_s14 = sshll.u32 %s1570_s9, 4  ;;  %s860_s14 = int_to_ptr.vmem [resolvable:$true] %s859_s14 }
 0x117   : > { %s1001_s23 = sshll.u32 %s846_s13, 7  ;;  %s1264_s5 = smov 256  }
 0x118   : > { %s848_s28 = scalar_lea.hbm %s1685_s4, %s1001_s23  ;;  %1108 = sst [smem:[#allocation6]] (%p1356_p8), %s1264_s5 }
 0x119   : > { %s1265_s6 = smov 512   ;;  %s1266_s7 = smov 2  }
 0x11a   : > { %1109 = sst [smem:[#allocation6 + $0x1]] (%p1356_p8), %s1265_s6  ;;  %s1267_s18 = smov 128  }
 0x11b   : > { %1110 = sst [smem:[#allocation6 + $0x2]] (%p1356_p8), %s1266_s7  ;;  %s1268_s19 = smov 8  }
 0x11c   : > { %1111 = sst [smem:[#allocation6 + $0x3]] (%p1356_p8), %s1267_s18  ;;  %s1269_s9 = smov 131072  }
 0x11d   : > { %1112 = sst [smem:[#allocation6 + $0x4]] (%p1356_p8), %s1267_s18  ;;  %s1270_s11 = smov 0  }
 0x11e   : > { %1113 = sst [smem:[#allocation6 + $0x5]] (%p1356_p8), %s1268_s19 }
 0x11f   : > { %1114 = dma.general (%p1356_p8), %s860_s14, 2048, %s848_s28, %s834_s10, %s1269_s9, [#allocation6], %s1270_s11, 0  }
 0x120 PF: > { %p1120_p1 = scmp.ge.s32.totalorder %s1261_s22, 2  ;;  %s887_s12 = sand.u32 1, %s1233_s15  }
 0x121   : > { %s888_s13 = scalar_lea.sflag [#allocation4], %s887_s12 }
 0x122   : > { %p1117_p2 = pnand %p1120_p1, %p1360_p9 }
 0x124   : > { %p1118_p3 = pneg %p1117_p2 }
 0x126   : > { %1228 = dma.done.wait (%p1118_p3), %s888_s13, 2048  }
 0x127   : > { %1230 = vsyncadd (%p1118_p3), %s888_s13, 4294965248  ;;  %s17_s22 = sadd.s32 1, %s1261_s22   ;;  %s1691_s15 = smov %s1237_s16 }
 0x128   : > { %p14_p4 = scmp.ge.s32.totalorder %s17_s22, 6   ;;  %s1692_s16 = smov %s1241_s17 }
 0x129   : > { %s1693_s17 = smov %s1368_s8  ;;  %s1694_s18 = smov %s1253_s20 }
 0x12a   : > { %s1695_s19 = smov %s1257_s21  ;;  %s1696_s20 = smov %s1699_s25 }
 0x12b   : > { %s1697_s21 = smov %s1703_s26  ;;  %16 = sbr.rel (!%p14_p4) target bundleno = 5 (0x5), region = 119 }
 0x130   :  { %893 = vsyncpa [#allocation4], 1 }
 0x131   :  { %895 = vsyncpa [#allocation4 + $0x1], 1 }

</bundles_post_ra>
